<compile_context>
chip_gen: v7x
topology: tpu7x:2x2x1
jax: 0.10.0
libtpu: 0.0.40
codegen_flags: <defaults>
</compile_context>

<pallas_src>
import functools
import math

import jax
import jax.numpy as jnp
from jax import lax
from jax.experimental import pallas as pl
from jax.experimental.pallas import tpu as pltpu


def _label_smoothing_kernel(x_ref, tgt_ref, out_ref, *, size, padding_idx,
                            confidence, smooth_val, log_conf, log_smooth,
                            n_rows, tm, tv):
    i = pl.program_id(0)   # row-tile index
    j = pl.program_id(1)   # vocab-tile index (reduction, innermost)

    @pl.when((i == 0) & (j == 0))
    def _():
        out_ref[...] = jnp.zeros_like(out_ref)

    x = x_ref[...]          # (tm, tv) f32 log-probs
    tgt = tgt_ref[...]      # (tm, 1)  int32 target ids

    col = lax.broadcasted_iota(jnp.int32, (tm, tv), 1) + j * tv
    row = lax.broadcasted_iota(jnp.int32, (tm, tv), 0) + i * tm

    on_target = col == tgt  # lane-broadcast compare against (tm, 1)
    td = jnp.where(on_target, jnp.float32(confidence), jnp.float32(smooth_val))
    log_td = jnp.where(on_target, jnp.float32(log_conf), jnp.float32(log_smooth))

    valid = tgt != padding_idx                 # zero rows whose target is <pad>
    valid &= col != padding_idx                # zero the padding column
    valid &= (row < n_rows) & (col < size)     # mask tail-tile padding
    valid &= td > 0.0                          # KLDiv: zero-prob terms are 0

    contrib = jnp.where(valid, td * (log_td - x), 0.0)
    out_ref[...] = out_ref[...] + jnp.sum(contrib)


def _round_up(a, b):
    return ((a + b - 1) // b) * b


def label_smoothing_loss(x, target, *, size, padding_idx, smoothing,
                         tm=256, tv=2048):
    """KLDiv(sum) loss against the label-smoothed target distribution.

    x: [N, size] log-probabilities; target: [N] int ids. Returns f32 scalar.
    """
    n, v = x.shape
    assert v == size, f"x.shape[1]={v} must equal size={size}"

    confidence = 1.0 - smoothing
    smooth_val = smoothing / (size - 2)
    log_conf = math.log(confidence) if confidence > 0.0 else 0.0
    log_smooth = math.log(smooth_val) if smooth_val > 0.0 else 0.0

    # Row tile: big (default 256) to amortize grid-step overhead; multiple of 8.
    tm_eff = min(tm, _round_up(n, 8))
    # Vocab tile: whole row if it fits (lane-dense when size >= 128), otherwise
    # a 128-multiple chunk so the x tile stays bounded in VMEM for huge vocabs.
    tv_eff = v if v <= tv else (tv // 128) * 128

    grid = (pl.cdiv(n, tm_eff), pl.cdiv(v, tv_eff))

    x = x.astype(jnp.float32)
    tgt2d = target.astype(jnp.int32).reshape(n, 1)

    kernel = functools.partial(
        _label_smoothing_kernel,
        size=size, padding_idx=padding_idx,
        confidence=confidence, smooth_val=smooth_val,
        log_conf=log_conf, log_smooth=log_smooth,
        n_rows=n, tm=tm_eff, tv=tv_eff)

    out = pl.pallas_call(
        kernel,
        out_shape=jax.ShapeDtypeStruct((1, 1), jnp.float32),
        grid_spec=pltpu.PrefetchScalarGridSpec(
            num_scalar_prefetch=0,
            grid=grid,
            in_specs=[
                pl.BlockSpec((tm_eff, tv_eff), lambda i, j: (i, j)),  # x tile
                pl.BlockSpec((tm_eff, 1), lambda i, j: (i, 0)),       # targets
            ],
            out_specs=pl.BlockSpec((1, 1), lambda i, j: (0, 0)),      # scalar acc
        ),
        compiler_params=pltpu.CompilerParams(
            # Output block is the same for every grid step (resident
            # accumulator), so both grid axes are reduction axes.
            dimension_semantics=("arbitrary", "arbitrary")),
        cost_estimate=pl.CostEstimate(
            flops=8 * n * v,
            transcendentals=0,                       # logs folded at trace time
            bytes_accessed=n * v * 4 + n * 4 + 4),
    )(x, tgt2d)

    return out[0, 0]


if __name__ == "__main__":
    # Small shapes consistent with the module: N = batch*seq rows of a
    # vocab-sized log-prob distribution.
    batch, seq, size = 2, 150, 512
    padding_idx, smoothing = 0, 0.1
    n = batch * seq   # 300 rows -> 2 row tiles, exercises tail masking + accum

    key = jax.random.PRNGKey(0)
    kx, kt = jax.random.split(key)
    logits = jax.random.normal(kx, (n, size), dtype=jnp.float32)
    x = jax.nn.log_softmax(logits, axis=-1)          # KLDivLoss expects log-probs
    target = jax.random.randint(kt, (n,), 0, size, dtype=jnp.int32)
    target = target.at[::7].set(padding_idx)         # ensure padded rows occur

    loss = label_smoothing_loss(x, target, size=size, padding_idx=padding_idx,
                                smoothing=smoothing)
    loss = jax.block_until_ready(loss)

    # Pure-JAX reference mirroring the PyTorch forward.
    confidence = 1.0 - smoothing
    smooth_val = smoothing / (size - 2)
    cols = jnp.arange(size)[None, :]
    td = jnp.where(cols == target[:, None], confidence, smooth_val)
    td = jnp.where(cols == padding_idx, 0.0, td)
    td = jnp.where((target != padding_idx)[:, None], td, 0.0)
    safe = jnp.where(td > 0, td, 1.0)
    ref = jnp.sum(jnp.where(td > 0, td * (jnp.log(safe) - x), 0.0))

    assert loss.shape == ()
    assert jnp.allclose(loss, ref, rtol=1e-5, atol=1e-2), (loss, ref)
    print("KERNEL_OK")
</pallas_src>

<mosaic_0001>
module attributes {stable_mosaic.version = 11 : i64} {
  func.func @_label_smoothing_kernel(%arg0: i32, %arg1: i32, %arg2: memref<256x512xf32, #tpu.memory_space<vmem>>, %arg3: memref<256x1xi32, #tpu.memory_space<vmem>>, %arg4: memref<1x1xf32, #tpu.memory_space<vmem>>) attributes {dimension_semantics = [#tpu.dimension_semantics<arbitrary>, #tpu.dimension_semantics<arbitrary>], iteration_bounds = array<i64: 2, 1>, scalar_prefetch = 0 : i64, scratch_operands = 0 : i64, tpu.core_type = #tpu.core_type<tc>, window_params = [{transform_indices = @transform_0, window_bounds = array<i64: 256, 512>}, {transform_indices = @transform_1, window_bounds = array<i64: 256, 1>}, {pipeline_mode = #tpu.pipeline_mode<synchronous>, transform_indices = @transform_2, window_bounds = array<i64: 1, 1>}]} {
    %c0_i32 = arith.constant 0 : i32
    %0 = arith.cmpi eq, %arg0, %c0_i32 : i32
    %c0_i32_0 = arith.constant 0 : i32
    %1 = arith.cmpi eq, %arg1, %c0_i32_0 : i32
    %2 = arith.andi %0, %1 : i1
    %3 = arith.extui %2 : i1 to i32
    %c0_i32_1 = arith.constant 0 : i32
    %4 = arith.cmpi ne, %3, %c0_i32_1 : i32
    scf.if %4 {
      %cst_18 = arith.constant 0.000000e+00 : f32
      %50 = vector.broadcast %cst_18 : f32 to vector<1x1xf32>
      %c0_19 = arith.constant 0 : index
      %c0_20 = arith.constant 0 : index
      %51 = vector.load %arg4[%c0_19, %c0_20] : memref<1x1xf32, #tpu.memory_space<vmem>>, vector<1x1xf32>
      tpu.vector_store %arg4[%c0_19, %c0_20], %50 {strides = array<i32>} : memref<1x1xf32, #tpu.memory_space<vmem>>, vector<1x1xf32>,
    } else {
    }
    %c0 = arith.constant 0 : index
    %c0_2 = arith.constant 0 : index
    %5 = vector.load %arg2[%c0, %c0_2] : memref<256x512xf32, #tpu.memory_space<vmem>>, vector<256x512xf32>
    %c0_3 = arith.constant 0 : index
    %c0_4 = arith.constant 0 : index
    %6 = vector.load %arg3[%c0_3, %c0_4] : memref<256x1xi32, #tpu.memory_space<vmem>>, vector<256x1xi32>
    %7 = tpu.iota {dimensions = array<i32: 1>} : vector<256x512xi32>
    %c512_i32 = arith.constant 512 : i32
    %8 = arith.muli %arg1, %c512_i32 : i32
    %9 = vector.broadcast %8 : i32 to vector<256x512xi32>
    %10 = arith.addi %7, %9 : vector<256x512xi32>
    %11 = tpu.iota {dimensions = array<i32: 0>} : vector<256x512xi32>
    %c256_i32 = arith.constant 256 : i32
    %12 = arith.muli %arg0, %c256_i32 : i32
    %13 = vector.broadcast %12 : i32 to vector<256x512xi32>
    %14 = arith.addi %11, %13 : vector<256x512xi32>
    %15 = vector.broadcast %6 : vector<256x1xi32> to vector<256x512xi32>
    %16 = arith.cmpi eq, %10, %15 : vector<256x512xi32>
    %cst = arith.constant 0.899999976 : f32
    %cst_5 = arith.constant 1.96078428E-4 : f32
    %17 = vector.broadcast %cst : f32 to vector<256x512xf32>
    %18 = vector.broadcast %cst_5 : f32 to vector<256x512xf32>
    %19 = arith.select %16, %17, %18 : vector<256x512xi1>, vector<256x512xf32>
    %cst_6 = arith.constant -0.105360515 : f32
    %cst_7 = arith.constant -8.53699588 : f32
    %20 = vector.broadcast %cst_6 : f32 to vector<256x512xf32>
    %21 = vector.broadcast %cst_7 : f32 to vector<256x512xf32>
    %22 = arith.select %16, %20, %21 : vector<256x512xi1>, vector<256x512xf32>
    %c0_i32_8 = arith.constant 0 : i32
    %23 = vector.broadcast %c0_i32_8 : i32 to vector<256x1xi32>
    %24 = arith.cmpi ne, %6, %23 : vector<256x1xi32>
    %c0_i32_9 = arith.constant 0 : i32
    %25 = vector.broadcast %c0_i32_9 : i32 to vector<256x512xi32>
    %26 = arith.cmpi ne, %10, %25 : vector<256x512xi32>
    %27 = vector.broadcast %24 : vector<256x1xi1> to vector<256x512xi1>
    %28 = arith.andi %27, %26 : vector<256x512xi1>
    %c300_i32 = arith.constant 300 : i32
    %29 = vector.broadcast %c300_i32 : i32 to vector<256x512xi32>
    %30 = arith.cmpi slt, %14, %29 : vector<256x512xi32>
    %c512_i32_10 = arith.constant 512 : i32
    %31 = vector.broadcast %c512_i32_10 : i32 to vector<256x512xi32>
    %32 = arith.cmpi slt, %10, %31 : vector<256x512xi32>
    %33 = arith.andi %30, %32 : vector<256x512xi1>
    %34 = arith.andi %28, %33 : vector<256x512xi1>
    %cst_11 = arith.constant 0.000000e+00 : f32
    %35 = vector.broadcast %cst_11 : f32 to vector<256x512xf32>
    %36 = arith.cmpf ogt, %19, %35 : vector<256x512xf32>
    %37 = arith.andi %34, %36 : vector<256x512xi1>
    %38 = arith.subf %22, %5 : vector<256x512xf32>
    %39 = arith.mulf %19, %38 : vector<256x512xf32>
    %cst_12 = arith.constant 0.000000e+00 : f32
    %40 = vector.broadcast %cst_12 : f32 to vector<256x512xf32>
    %41 = arith.select %37, %39, %40 : vector<256x512xi1>, vector<256x512xf32>
    %c0_13 = arith.constant 0 : index
    %c0_14 = arith.constant 0 : index
    %42 = vector.load %arg4[%c0_13, %c0_14] : memref<1x1xf32, #tpu.memory_space<vmem>>, vector<1x1xf32>
    %43 = vector.shape_cast %41 : vector<256x512xf32> to vector<1x256x512xf32>
    %cst_15 = arith.constant dense<0.000000e+00> : vector<1xf32>
    %44 = vector.multi_reduction <add>, %43, %cst_15 [1, 2] : vector<1x256x512xf32> to vector<1xf32>
    %45 = vector.shape_cast %44 : vector<1xf32> to vector<1x1x1xf32>
    %46 = vector.extract %45[0, 0, 0] : f32 from vector<1x1x1xf32>
    %47 = vector.broadcast %46 : f32 to vector<1x1xf32>
    %48 = arith.addf %42, %47 : vector<1x1xf32>
    %c0_16 = arith.constant 0 : index
    %c0_17 = arith.constant 0 : index
    %49 = vector.load %arg4[%c0_16, %c0_17] : memref<1x1xf32, #tpu.memory_space<vmem>>, vector<1x1xf32>
    tpu.vector_store %arg4[%c0_16, %c0_17], %48 {strides = array<i32>} : memref<1x1xf32, #tpu.memory_space<vmem>>, vector<1x1xf32>,
    return
  }
  func.func @transform_0(%arg0: i32, %arg1: i32) -> (i32, i32) {
    %c0_i32 = arith.constant 0 : i32
    return %arg0, %arg1 : i32, i32
  }
  func.func @transform_1(%arg0: i32, %arg1: i32) -> (i32, i32) {
    %c0_i32 = arith.constant 0 : i32
    %c0_i32_0 = arith.constant 0 : i32
    return %arg0, %c0_i32 : i32, i32
  }
  func.func @transform_2(%arg0: i32, %arg1: i32) -> (i32, i32) {
    %c0_i32 = arith.constant 0 : i32
    %c0_i32_0 = arith.constant 0 : i32
    %c0_i32_1 = arith.constant 0 : i32
    return %c0_i32, %c0_i32_0 : i32, i32
  }
}

</mosaic_0001>

<bundles_post_ra>
// kernel: tpu_custom_call.1
= control target key start
LH: loop header
LB: loop body
LE: loop exit
PB: predicated region body
PF: predicated region fallthrough
CT: control target
= control target key end

     0   :  { %7 = vsyncpa [#allocation3], 0  ;;  %s6222_s0 = inlined_call_operand.hbm [shape: f32[300,512], index: 0, kind: input, shape index: {}]   ;;  %s6223_s1 = inlined_call_operand.vmem [shape: s32[300,1], index: 1, kind: input, shape index: {}]   ;;  %s6224_s2 = inlined_call_operand.hbm [shape: f32[1,1], index: 2, kind: output, shape index: {}]  }
   0x1   :  { %9 = vsyncpa [#allocation3 + $0x1], 0 }
   0x2   :  { %10 = vsyncpa [#allocation4], 0  ;;  %s2652_s9 = smov 0   ;;  %s2654_s10 = smov 0  }
   0x3   :  { %s2656_s11 = smov 0   ;;  %s2658_s12 = smov 0  }
   0x4   :  { %s2660_s13 = smov 0   ;;  %s2662_s14 = smov 0  }
   0x5 LB: > { %s2427_s15 = sadd.s32 4294967295, %s2627_s14   ;;  %s28_s16 = sadd.s32 1, %s2623_s13  ;;  %s2627_s14 = sphi %s2662_s14, %s16_s14   ;;  %s2623_s13 = sphi %s2660_s13, %s6720_s13   ;;  %s2619_s12 = sphi %s2658_s12, %s6719_s12   ;;  %s2615_s11 = sphi %s2656_s11, %s6718_s11   ;;  %s2611_s10 = sphi %s2654_s10, %s6717_s10   ;;  %s2607_s9 = sphi %s2652_s9, %s6716_s9  }
   0x6   : > { %p30_p0 = scmp.ge.s32.totalorder %s28_s16, 2  ;;  %s37_s17 = sadd.s32 1, %s2615_s11 }
   0x7   : > { %p44_p1 = scmp.ne.s32.totalorder %s2615_s11, %s2611_s10  ;;  %p45_p2 = scmp.eq.s32.totalorder %s2627_s14, 0 }
   0x8   : > { %s6722_s16 = smov (%p30_p0, %s28_s16), 0  ;;  %p50_p4 = scmp.ne.s32.totalorder %s2611_s10, %s2607_s9 }
   0x9   : > { %p46_p3 = por %p45_p2, %p44_p1  ;;  %s32_s18 = ssub.s32 %s2623_s13, %s6722_s16 }
   0xa   : > { %p51_p5 = scmp.eq.s32.totalorder %s2427_s15, 0  ;;  %p35_p6 = scmp.eq.s32.totalorder %s32_s18, 0 }
   0xb   : > { %p2429_p8 = scmp.ge.s32.totalorder %s2627_s14, 2 }
   0xc   : > { %p2693_p7 = por %p51_p5, %p50_p4 }
   0xd   : > { %s2698_s20 = scalar_select %p35_p6, %s2615_s11, %s37_s17  }
   0xe   : > { %117 = sbr.rel (%p2429_p8) target bundleno = 56 (0x38), region = 16 }
  0x15   : > { %120 = sbr.rel (!%p46_p3) target bundleno = 56 (0x38), region = 20  ;;  %s121_s21 = sand.u32 (%p46_p3), 1, %s2615_s11  }
  0x16   : > { %s2431_s22 = sshll.u32 (%p46_p3), %s2623_s13, 5  ;;  %s2430_s23 = sshll.u32 (%p46_p3), %s121_s21, 10 }
  0x17   : > { %s128_s24 = ssub.s32 (%p46_p3), 38, %s2431_s22  ;;  %s2706_s27 = scalar_lea.sflag (%p46_p3), [#allocation3], %s121_s21 }
  0x18   : > { %p129_p9 = scmp.lt.s32.totalorder (%p46_p3), %s128_s24, 32  ;;  %s125_s28 = scalar_lea.vmem (%p46_p3), [#allocation2], %s2430_s23 }
  0x1c   : > { %s6724_s24 = smov (!%p129_p9, %s128_s24), 32 }
  0x1d   : > { %s2703_s25 = sshll.u32 %s6724_s24, 9 }
  0x1e   : > { %s134_s26 = ssub.s32 16384, %s2703_s25 }
  0x1f   : > { %135 = vsyncadd %s2706_s27, %s134_s26  ;;  %p2434_p10 = scmp.ne.s32.totalorder %s2703_s25, 0  ;;  %s2451_s29 = sshll.u32 %s2623_s13, 14 }
  0x20   : > { %s2714_s4 = scalar_lea.hbm %s6222_s0, %s2451_s29  ;;  %s142_s5 = sshll.u32 %s125_s28, 4  ;;  %s2716_s5 = int_to_ptr.vmem [resolvable:$true] %s142_s5 }
  0x21   : > { %s2519_s6 = scalar_lea.hbm %s2714_s4, %s2703_s25  ;;  %s2523_s9 = scalar_lea.hbm %s6222_s0, 19456 }
  0x22   : > { %p2520_p11 = scmp.ne.s32.totalorder %s2714_s4, %s2519_s6  ;;  %p2524_p0 = scmp.lt.u32.totalorder %s2714_s4, %s6222_s0 }
  0x23   : > { %p2525_p1 = scmp.lt.u32.totalorder %s2523_s9, %s2519_s6  ;;  %p2527_p3 = scmp.lt.u32.totalorder %s2519_s6, %s2714_s4 }
  0x24   : > { %p2521_p12 = pnand %p2520_p11, %p2434_p10 }
  0x25   : > { %p2526_p2 = por %p2525_p1, %p2524_p0 }
  0x26   : > { %p2522_p13 = pneg %p2521_p12 }
  0x27   : > { %p2528_p4 = por %p2527_p3, %p2526_p2 }
  0x29   : > { %p2529_p5 = pnand %p2528_p4, %p2522_p13 }
  0x2b   : > { %2532 = shalt.err (!%p2529_p5)
}
  0x2c   : > { %s2533_s21 = scalar_lea.vmem %s2716_s5, %s2703_s25  ;;  %s2629_s22 = smov [#allocation2]  }
  0x2d   : > { %p2534_p6 = scmp.ne.s32.totalorder %s2716_s5, %s2533_s21  ;;  %s2537_s23 = sshll.u32 %s2629_s22, 4  ;;  %s2538_s23 = int_to_ptr.vmem [resolvable:$false] %s2537_s23 }
  0x2e   : > { %s2539_s24 = scalar_lea.vmem %s2538_s23, 32768  ;;  %p2540_p11 = scmp.lt.s32.totalorder %s2716_s5, %s2538_s23 }
  0x2f   : > { %p2535_p8 = pnand %p2534_p6, %p2434_p10  ;;  %p2541_p12 = scmp.lt.s32.totalorder %s2539_s24, %s2533_s21 }
  0x31   : > { %p2536_p9 = pneg %p2535_p8  ;;  %p2542_p0 = por %p2541_p12, %p2540_p11 }
  0x33   : > { %p2543_p1 = pnand %p2542_p0, %p2536_p9 }
  0x35   : > { %2546 = shalt.err (!%p2543_p1)
}
  0x36   : > { %s2630_s26 = smov 512   ;;  %s2631_s28 = smov 32  }
  0x37   : > { %148 = dma.hbm_to_vmem [thread:$0]  (%p2434_p10), %s2714_s4, %s2703_s25, %s2716_s5, %s2706_s27, %s2630_s26, %s2630_s26, %s2631_s28  }
  0x38 PF: > { %p2439_p13 = scmp.ge.s32.totalorder %s2627_s14, 1  ;;  %p167_p2 = scmp.lt.s32.totalorder %s2627_s14, 3 }
  0x3a   : > { %p168_p3 = pnand %p2439_p13, %p167_p2 }
  0x3b   : > { %s173_s29 = sand.u32 (!%p168_p3), 1, %s2611_s10  }
  0x3c   : > { %171 = sbr.rel (%p168_p3) target bundleno = 727 (0x2d7), region = 28  ;;  %s2440_s30 = sshll.u32 (!%p168_p3), %s173_s29, 10 }
  0x3d   : > { %s174_s3 = scalar_lea.sflag (!%p168_p3), [#allocation3], %s173_s29  ;;  %s2746_s6 = scalar_lea.vmem (!%p168_p3), [#allocation2], %s2440_s30 }
  0x43   : > { %2598 = dma.done.wait (%p2693_p7), %s174_s3, 16384  }
  0x44   : > { %2600 = vsyncadd (%p2693_p7), %s174_s3, 4294950912  ;;  %s2441_s25 = sshll.u32 %s2619_s12, 5  ;;  %p223_p10 = scmp.eq.s32.totalorder %s2619_s12, 0 }
  0x45   : > { %p214_p4 = scmp.lt.s32.totalorder %s2441_s25, 37  ;;  %vm229_vm0 = vcmask (%p223_p10), 0   ;;  %v2632_v0 = vmov (%p223_p10), 0.0  }
  0x46   : > { %228 = sbr.rel (!%p223_p10) target bundleno = 77 (0x4d), region = 36  ;;  %230 = vst.msk [vmem:[#allocation5] sm:$0x1] (%p223_p10), %vm229_vm0, %v2632_v0 }
  0x47   : > { %s6726_s25 = smov (!%p214_p4, %s2441_s25), 37 }
  0x48   : > { %s2442_s27 = sshll.u32 %s6726_s25, 3 }
  0x49   : > { %s2757_s7 = scalar_lea.vmem %s6223_s1, %s2442_s27 }
  0x4d PF: > { %v360_v1 = vld [vmem:[%s2757_s7 + $0x8] sm:$0xff]  ;;  %v359_v2 = vld [vmem:[%s2757_s7] sm:$0xff]  ;;  %v2633_v3 = vmov 0   ;;  %v361_v4 = vld [vmem:[%s2757_s7 + $0x10] sm:$0xff]  ;;  %v391_v62 = vlaneseq  ;;  %s2444_s19 = sshll.u32 %s2619_s12, 8  ;;  %s2636_s12 = smov [#allocation5]  }
  0x4e   : > { %2518 = vset.pattern.permute.xlu1 %v2633_v3  ;;  %2517 = vset.pattern.permute.xlu0 %v2633_v3  ;;  %vm950_vm1 = vcmp.ne.s32.totalorder %v360_v1, 0  ;;  %vm949_vm2 = vcmp.ne.s32.totalorder %v359_v2, 0  ;;  %vm951_vm3 = vcmp.ne.s32.totalorder %v361_v4, 0  ;;  %v362_v7 = vld [vmem:[%s2757_s7 + $0x18] sm:$0xff]  ;;  %v363_v9 = vld [vmem:[%s2757_s7 + $0x20] sm:$0xff]  ;;  %v364_v11 = vld [vmem:[%s2757_s7 + $0x28] sm:$0xff] }
  0x4f   : > { %473 = vperm.xlu1 %2518, %v360_v1   ;;  %470 = vperm.xlu0 %2517, %v359_v2   ;;  %v986_v5 = vsel %vm950_vm1, 1, %v2633_v3  ;;  %v985_v6 = vsel %vm949_vm2, 1, %v2633_v3  ;;  %v987_v8 = vsel %vm951_vm3, 1, %v2633_v3  ;;  %vm952_vm4 = vcmp.ne.s32.totalorder %v362_v7, 0  ;;  %v365_v13 = vld [vmem:[%s2757_s7 + $0x30] sm:$0xff]  ;;  %v366_v15 = vld [vmem:[%s2757_s7 + $0x38] sm:$0xff] }
  0x50   : > { %v988_v10 = vsel %vm952_vm4, 1, %v2633_v3  ;;  %vm953_vm5 = vcmp.ne.s32.totalorder %v363_v9, 0  ;;  %vm954_vm6 = vcmp.ne.s32.totalorder %v364_v11, 0  ;;  %vm955_vm7 = vcmp.ne.s32.totalorder %v365_v13, 0  ;;  %v367_v17 = vld [vmem:[%s2757_s7 + $0x40] sm:$0xff]  ;;  %v368_v19 = vld [vmem:[%s2757_s7 + $0x48] sm:$0xff] }
  0x51   : > { %v989_v12 = vsel %vm953_vm5, 1, %v2633_v3  ;;  %v990_v14 = vsel %vm954_vm6, 1, %v2633_v3  ;;  %v991_v16 = vsel %vm955_vm7, 1, %v2633_v3  ;;  %vm956_vm8 = vcmp.ne.s32.totalorder %v366_v15, 0  ;;  %v369_v21 = vld [vmem:[%s2757_s7 + $0x50] sm:$0xff]  ;;  %v370_v23 = vld [vmem:[%s2757_s7 + $0x58] sm:$0xff] }
  0x52   : > { %v992_v18 = vsel %vm956_vm8, 1, %v2633_v3  ;;  %vm957_vm9 = vcmp.ne.s32.totalorder %v367_v17, 0  ;;  %vm958_vm10 = vcmp.ne.s32.totalorder %v368_v19, 0  ;;  %vm959_vm11 = vcmp.ne.s32.totalorder %v369_v21, 0  ;;  %v371_v25 = vld [vmem:[%s2757_s7 + $0x60] sm:$0xff]  ;;  %v372_v27 = vld [vmem:[%s2757_s7 + $0x68] sm:$0xff] }
  0x53   : > { %1021 = vperm.xlu1 %2518, %v986_v5   ;;  %1018 = vperm.xlu0 %2517, %v985_v6   ;;  %v993_v20 = vsel %vm957_vm9, 1, %v2633_v3  ;;  %v994_v22 = vsel %vm958_vm10, 1, %v2633_v3  ;;  %v995_v24 = vsel %vm959_vm11, 1, %v2633_v3  ;;  %vm960_vm12 = vcmp.ne.s32.totalorder %v370_v23, 0  ;;  %v373_v29 = vld [vmem:[%s2757_s7 + $0x70] sm:$0xff]  ;;  %v374_v31 = vld [vmem:[%s2757_s7 + $0x78] sm:$0xff] }
  0x54   : > { %v996_v26 = vsel %vm960_vm12, 1, %v2633_v3  ;;  %vm961_vm13 = vcmp.ne.s32.totalorder %v371_v25, 0  ;;  %vm962_vm14 = vcmp.ne.s32.totalorder %v372_v27, 0  ;;  %vm963_vm15 = vcmp.ne.s32.totalorder %v373_v29, 0  ;;  %v375_v33 = vld [vmem:[%s2757_s7 + $0x80] sm:$0xff]  ;;  %v376_v35 = vld [vmem:[%s2757_s7 + $0x88] sm:$0xff] }
  0x55   : > { %v997_v28 = vsel %vm961_vm13, 1, %v2633_v3  ;;  %v998_v30 = vsel %vm962_vm14, 1, %v2633_v3  ;;  %v999_v32 = vsel %vm963_vm15, 1, %v2633_v3  ;;  %vm964_vm0 = vcmp.ne.s32.totalorder %v374_v31, 0  ;;  %v377_v37 = vld [vmem:[%s2757_s7 + $0x90] sm:$0xff]  ;;  %v378_v39 = vld [vmem:[%s2757_s7 + $0x98] sm:$0xff] }
  0x56   : > { %v1000_v34 = vsel %vm964_vm0, 1, %v2633_v3  ;;  %vm965_vm1 = vcmp.ne.s32.totalorder %v375_v33, 0  ;;  %vm966_vm2 = vcmp.ne.s32.totalorder %v376_v35, 0  ;;  %vm967_vm3 = vcmp.ne.s32.totalorder %v377_v37, 0  ;;  %v379_v41 = vld [vmem:[%s2757_s7 + $0xa0] sm:$0xff]  ;;  %v380_v43 = vld [vmem:[%s2757_s7 + $0xa8] sm:$0xff] }
  0x57   : > { %1024 = vperm.xlu1 %2518, %v987_v8   ;;  %476 = vperm.xlu0 %2517, %v361_v4   ;;  %v1001_v36 = vsel %vm965_vm1, 1, %v2633_v3  ;;  %v1002_v38 = vsel %vm966_vm2, 1, %v2633_v3  ;;  %v1003_v40 = vsel %vm967_vm3, 1, %v2633_v3  ;;  %vm968_vm4 = vcmp.ne.s32.totalorder %v378_v39, 0  ;;  %v381_v45 = vld [vmem:[%s2757_s7 + $0xb0] sm:$0xff]  ;;  %v382_v47 = vld [vmem:[%s2757_s7 + $0xb8] sm:$0xff] }
  0x58   : > { %v1004_v42 = vsel %vm968_vm4, 1, %v2633_v3  ;;  %vm969_vm5 = vcmp.ne.s32.totalorder %v379_v41, 0  ;;  %vm970_vm6 = vcmp.ne.s32.totalorder %v380_v43, 0  ;;  %vm971_vm7 = vcmp.ne.s32.totalorder %v381_v45, 0  ;;  %v383_v49 = vld [vmem:[%s2757_s7 + $0xc0] sm:$0xff]  ;;  %v384_v51 = vld [vmem:[%s2757_s7 + $0xc8] sm:$0xff] }
  0x59   : > { %v1005_v44 = vsel %vm969_vm5, 1, %v2633_v3  ;;  %v1006_v46 = vsel %vm970_vm6, 1, %v2633_v3  ;;  %v1007_v48 = vsel %vm971_vm7, 1, %v2633_v3  ;;  %vm972_vm8 = vcmp.ne.s32.totalorder %v382_v47, 0  ;;  %v385_v53 = vld [vmem:[%s2757_s7 + $0xd0] sm:$0xff]  ;;  %v386_v55 = vld [vmem:[%s2757_s7 + $0xd8] sm:$0xff] }
  0x5a   : > { %v1008_v50 = vsel %vm972_vm8, 1, %v2633_v3  ;;  %vm973_vm9 = vcmp.ne.s32.totalorder %v383_v49, 0  ;;  %vm974_vm10 = vcmp.ne.s32.totalorder %v384_v51, 0  ;;  %vm975_vm11 = vcmp.ne.s32.totalorder %v385_v53, 0  ;;  %v387_v57 = vld [vmem:[%s2757_s7 + $0xe0] sm:$0xff]  ;;  %v388_v59 = vld [vmem:[%s2757_s7 + $0xe8] sm:$0xff] }
  0x5b   : > { %1027 = vperm.xlu1 %2518, %v988_v10   ;;  %479 = vperm.xlu0 %2517, %v362_v7   ;;  %v1009_v52 = vsel %vm973_vm9, 1, %v2633_v3  ;;  %v1010_v54 = vsel %vm974_vm10, 1, %v2633_v3  ;;  %v1011_v56 = vsel %vm975_vm11, 1, %v2633_v3  ;;  %vm976_vm12 = vcmp.ne.s32.totalorder %v386_v55, 0  ;;  %v389_v61 = vld [vmem:[%s2757_s7 + $0xf0] sm:$0xff]  ;;  %v390_v0 = vld [vmem:[%s2757_s7 + $0xf8] sm:$0xff] }
  0x5c   : > { %v1012_v58 = vsel %vm976_vm12, 1, %v2633_v3  ;;  %vm977_vm13 = vcmp.ne.s32.totalorder %v387_v57, 0  ;;  %vm978_vm14 = vcmp.ne.s32.totalorder %v388_v59, 0  ;;  %vm979_vm15 = vcmp.ne.s32.totalorder %v389_v61, 0  ;;  %s2353_s8 = sshll.u32 %s2636_s12, 4  ;;  %p6178_p7 = scmp.eq.s32.totalorder %s2427_s15, 1  ;;  %s2354_s8 = int_to_ptr.vmem [resolvable:$true] %s2353_s8 }
  0x5d   : > { %v1013_v60 = vsel %vm977_vm13, 1, %v2633_v3  ;;  %v1014_v63 = vsel %vm978_vm14, 1, %v2633_v3  ;;  %v2823_v1 = vshrl.u32 %v391_v62, 7  ;;  %vm980_vm0 = vcmp.ne.s32.totalorder %v390_v0, 0  ;;  %s2547_s18 = scalar_lea.vmem %s2354_s8, 16  ;;  %s2553_s21 = scalar_lea.vmem %s2354_s8, 32 }
  0x5e   : > { %v1015_v2 = vsel %vm979_vm15, 1, %v2633_v3  ;;  %v2826_v4 = vand.u32 127, %v391_v62  ;;  %v1016_v6 = vsel %vm980_vm0, 1, %v2633_v3  ;;  %v2831_v7 = vstv %s2444_s19  ;;  %p2548_p5 = scmp.ne.s32.totalorder %s2354_s8, %s2547_s18  ;;  %p2554_p9 = scmp.lt.s32.totalorder %s2354_s8, %s2354_s8 }
  0x5f   : > { %1030 = vperm.xlu1 %2518, %v989_v12   ;;  %482 = vperm.xlu0 %2517, %v363_v9   ;;  %v404_v5 = vadd.s32 8, %v2823_v1  ;;  %v405_v8 = vadd.s32 16, %v2823_v1  ;;  %v406_v9 = vadd.s32 24, %v2823_v1  ;;  %v407_v10 = vadd.s32 32, %v2823_v1  ;;  %p2555_p11 = scmp.lt.s32.totalorder %s2553_s21, %s2547_s18 }
  0x60   : > { %v2840_v12 = vadd.s32 256, %v2826_v4  ;;  %v409_v3 = vadd.s32 48, %v2823_v1  ;;  %vm6227_vm6 = vcmp.ne.s32.totalorder %v2826_v4, 0  ;;  %p2549_p6 = pnand %p2548_p5, %p6178_p7 }
  0x61   : > { %p2556_p12 = por %p2555_p11, %p2554_p9 }
  0x62   : > { %p2550_p8 = pneg %p2549_p6 }
  0x63   : > { %1033 = vperm.xlu1 %2518, %v990_v14   ;;  %485 = vperm.xlu0 %2517, %v364_v11   ;;  %v2837_v11 = vadd.s32 128, %v2826_v4  ;;  %v2845_v14 = vadd.s32 %v2831_v7, %v404_v5 }
  0x64   : > { %p2557_p0 = pnand %p2556_p12, %p2550_p8 }
  0x65   : > { %vm1274_vm1 = vcmp.lt.s32.totalorder %v2845_v14, 300 }
  0x67   : > { %1036 = vperm.xlu1 %2518, %v991_v16   ;;  %488 = vperm.xlu0 %2517, %v365_v13   ;;  %v408_v13 = vadd.s32 40, %v2823_v1  ;;  %v411_v16 = vadd.s32 64, %v2823_v1 }
  0x6b   : > { %1039 = vperm.xlu1 %2518, %v992_v18   ;;  %491 = vperm.xlu0 %2517, %v366_v15   ;;  %v410_v15 = vadd.s32 56, %v2823_v1  ;;  %v2852_v18 = vadd.s32 %v2831_v7, %v2823_v1 }
  0x6d   : > { %vm1273_vm11 = vcmp.lt.s32.totalorder %v2852_v18, 300 }
  0x6f   : > { %1042 = vperm.xlu1 %2518, %v993_v20   ;;  %494 = vperm.xlu0 %2517, %v367_v17   ;;  %v412_v17 = vadd.s32 72, %v2823_v1  ;;  %v414_v20 = vadd.s32 88, %v2823_v1 }
  0x73   : > { %1045 = vperm.xlu1 %2518, %v994_v22   ;;  %497 = vperm.xlu0 %2517, %v368_v19   ;;  %v413_v19 = vadd.s32 80, %v2823_v1  ;;  %v2858_v22 = vadd.s32 384, %v2826_v4 }
  0x77   : > { %1048 = vperm.xlu1 %2518, %v995_v24   ;;  %500 = vperm.xlu0 %2517, %v369_v21   ;;  %v415_v21 = vadd.s32 96, %v2823_v1  ;;  %v2864_v24 = vadd.s32 %v2831_v7, %v406_v9 }
  0x7b   : > { %1051 = vperm.xlu1 %2518, %v996_v26   ;;  %503 = vperm.xlu0 %2517, %v370_v23   ;;  %v2861_v23 = vadd.s32 %v2831_v7, %v405_v8  ;;  %v2870_v26 = vadd.s32 %v2831_v7, %v408_v13  ;;  %v2635_v8 = vmov 0.00019607843  }
  0x7f   : > { %1054 = vperm.xlu1 %2518, %v997_v28   ;;  %506 = vperm.xlu0 %2517, %v371_v25   ;;  %v2867_v25 = vadd.s32 %v2831_v7, %v407_v10  ;;  %v416_v28 = vadd.s32 104, %v2823_v1 }
  0x83   : > { %1057 = vperm.xlu1 %2518, %v998_v30   ;;  %509 = vperm.xlu0 %2517, %v372_v27   ;;  %v2873_v27 = vadd.s32 %v2831_v7, %v409_v3  ;;  %v2878_v30 = vadd.s32 %v2831_v7, %v410_v15 }
  0x87   : > { %1060 = vperm.xlu1 %2518, %v999_v32   ;;  %512 = vperm.xlu0 %2517, %v373_v29   ;;  %v417_v29 = vadd.s32 112, %v2823_v1  ;;  %v2884_v32 = vadd.s32 %v2831_v7, %v412_v17 }
  0x8b   : > { %1063 = vperm.xlu1 %2518, %v1000_v34   ;;  %515 = vperm.xlu0 %2517, %v374_v31   ;;  %v2881_v31 = vadd.s32 %v2831_v7, %v411_v16 }
  0x8f   : > { %1066 = vperm.xlu1 %2518, %v1001_v36   ;;  %518 = vperm.xlu0 %2517, %v375_v33   ;;  %v418_v33 = vadd.s32 120, %v2823_v1  ;;  %v2891_v36 = vadd.s32 %v2831_v7, %v413_v19 }
  0x93   : > { %1069 = vperm.xlu1 %2518, %v1002_v38   ;;  %521 = vperm.xlu0 %2517, %v376_v35   ;;  %v2897_v38 = vadd.s32 %v2831_v7, %v415_v21 }
  0x97   : > { %1072 = vperm.xlu1 %2518, %v1003_v40   ;;  %524 = vperm.xlu0 %2517, %v377_v37   ;;  %v2894_v37 = vadd.s32 %v2831_v7, %v414_v20  ;;  %v235_v40 = vld [vmem:[%s2746_s6 + $0x20] sm:$0xff] }
  0x9b   : > { %1075 = vperm.xlu1 %2518, %v1004_v42   ;;  %527 = vperm.xlu0 %2517, %v378_v39   ;;  %v419_v39 = vadd.s32 128, %v2823_v1  ;;  %v237_v42 = vld [vmem:[%s2746_s6 + $0x30] sm:$0xff] }
  0x9f   : > { %1078 = vperm.xlu1 %2518, %v1005_v44   ;;  %530 = vperm.xlu0 %2517, %v379_v41   ;;  %v236_v41 = vld [vmem:[%s2746_s6 + $0x28] sm:$0xff]  ;;  %v6225_v44 = vmov -8.536996  }
  0xa3   : > { %1081 = vperm.xlu1 %2518, %v1006_v46   ;;  %533 = vperm.xlu0 %2517, %v380_v43   ;;  %v238_v43 = vld [vmem:[%s2746_s6 + $0x38] sm:$0xff]  ;;  %v231_v46 = vld [vmem:[%s2746_s6] sm:$0xff] }
  0xa7   : > { %1084 = vperm.xlu1 %2518, %v1007_v48   ;;  %536 = vperm.xlu0 %2517, %v381_v45   ;;  %v2919_v48 = vadd.s32 %v2831_v7, %v417_v29 }
  0xab   : > { %1087 = vperm.xlu1 %2518, %v1008_v50   ;;  %539 = vperm.xlu0 %2517, %v382_v47   ;;  %v2916_v47 = vadd.s32 %v2831_v7, %v416_v28 }
  0xaf   : > { %1090 = vperm.xlu1 %2518, %v1009_v52   ;;  %542 = vperm.xlu0 %2517, %v383_v49   ;;  %v2931_v52 = vadd.s32 %v2831_v7, %v418_v33 }
  0xb3   : > { %1093 = vperm.xlu1 %2518, %v1010_v54   ;;  %545 = vperm.xlu0 %2517, %v384_v51   ;;  %v233_v54 = vld [vmem:[%s2746_s6 + $0x10] sm:$0xff] }
  0xb7   : > { %1096 = vperm.xlu1 %2518, %v1011_v56   ;;  %548 = vperm.xlu0 %2517, %v385_v53   ;;  %v232_v53 = vld [vmem:[%s2746_s6 + $0x8] sm:$0xff]  ;;  %v2943_v56 = vadd.s32 %v2831_v7, %v419_v39 }
  0xbb   : > { %1099 = vperm.xlu1 %2518, %v1012_v58   ;;  %551 = vperm.xlu0 %2517, %v386_v55   ;;  %v234_v55 = vld [vmem:[%s2746_s6 + $0x18] sm:$0xff] }
  0xbf   : > { %1102 = vperm.xlu1 %2518, %v1013_v60   ;;  %554 = vperm.xlu0 %2517, %v387_v57  }
  0xc3   : > { %1105 = vperm.xlu1 %2518, %v1014_v63   ;;  %557 = vperm.xlu0 %2517, %v388_v59  }
  0xc7   : > { %1108 = vperm.xlu1 %2518, %v1015_v2   ;;  %560 = vperm.xlu0 %2517, %v389_v61  }
  0xcb   : > { %1111 = vperm.xlu1 %2518, %v1016_v6   ;;  %563 = vperm.xlu0 %2517, %v390_v0  }
  0xce   : > { %v474_v34 = vpop.permute.xlu1 %473  ;;  %v2887_v35 = vpop.permute.xlu0 %470 }
  0xcf   : > { %vm569_vm2 = vcmp.eq.s32.totalorder %v2826_v4, %v474_v34  ;;  %vm570_vm3 = vcmp.eq.s32.totalorder %v2837_v11, %v474_v34  ;;  %vm571_vm4 = vcmp.eq.s32.totalorder %v2840_v12, %v474_v34  ;;  %vm572_vm5 = vcmp.eq.s32.totalorder %v2858_v22, %v474_v34 }
  0xd0   : > { %v825_v45 = vsel %vm569_vm2, -0.105360515, %v6225_v44  ;;  %vm565_vm7 = vcmp.eq.s32.totalorder %v2826_v4, %v2887_v35  ;;  %v826_v49 = vsel %vm570_vm3, -0.105360515, %v6225_v44  ;;  %v827_v50 = vsel %vm571_vm4, -0.105360515, %v6225_v44 }
  0xd1   : > { %v828_v51 = vsel %vm572_vm5, -0.105360515, %v6225_v44  ;;  %vm566_vm8 = vcmp.eq.s32.totalorder %v2837_v11, %v2887_v35  ;;  %vm567_vm9 = vcmp.eq.s32.totalorder %v2840_v12, %v2887_v35  ;;  %vm568_vm10 = vcmp.eq.s32.totalorder %v2858_v22, %v2887_v35 }
  0xd2   : > { %v1825_v57 = vsub.f32 %v825_v45, %v235_v40  ;;  %v821_v58 = vsel %vm565_vm7, -0.105360515, %v6225_v44  ;;  %v822_v59 = vsel %vm566_vm8, -0.105360515, %v6225_v44  ;;  %v823_v60 = vsel %vm567_vm9, -0.105360515, %v6225_v44  ;;  %v1022_v61 = vpop.permute.xlu1 %1021  ;;  %v2957_v62 = vpop.permute.xlu0 %1018 }
  0xd3   : > { %v1826_v63 = vsub.f32 %v826_v49, %v236_v41  ;;  %v1827_v0 = vsub.f32 %v827_v50, %v237_v42  ;;  %v1828_v2 = vsub.f32 %v828_v51, %v238_v43  ;;  %v824_v5 = vsel %vm568_vm10, -0.105360515, %v6225_v44  ;;  %v239_v50 = vld [vmem:[%s2746_s6 + $0x40] sm:$0xff]  ;;  %v240_v51 = vld [vmem:[%s2746_s6 + $0x48] sm:$0xff] }
  0xd4   : > { %v1821_v6 = vsub.f32 %v821_v58, %v231_v46  ;;  %v697_v9 = vsel %vm569_vm2, 0.9, %v2635_v8  ;;  %v698_v10 = vsel %vm570_vm3, 0.9, %v2635_v8  ;;  %v699_v13 = vsel %vm571_vm4, 0.9, %v2635_v8 }
  0xd5   : > { %v1822_v3 = vsub.f32 %v822_v59, %v232_v53  ;;  %v1823_v15 = vsub.f32 %v823_v60, %v233_v54  ;;  %v1824_v16 = vsub.f32 %v824_v5, %v234_v55  ;;  %v700_v17 = vsel %vm572_vm5, 0.9, %v2635_v8  ;;  %v241_v53 = vld [vmem:[%s2746_s6 + $0x50] sm:$0xff] }
  0xd6   : > { %vm1569_vm12 = vcmp.gt.f32.partialorder %v697_v9, 0.0  ;;  %vm1570_vm13 = vcmp.gt.f32.partialorder %v698_v10, 0.0  ;;  %vm1571_vm14 = vcmp.gt.f32.partialorder %v699_v13, 0.0  ;;  %vm1114_vm15 = vcmp.eq.s32.totalorder %v1022_v61, 1  ;;  %v3008_v39 = vpop.permute.xlu1 %1024  ;;  %v477_v40 = vpop.permute.xlu0 %476 }
  0xd7   : > { %vm1572_vm0 = vcmp.gt.f32.partialorder %v700_v17, 0.0  ;;  %vm1149_vm2 = vmand %vm1114_vm15, %vm6227_vm6  ;;  %v2978_v19 = vmul.f32 %v1825_v57, %v697_v9  ;;  %v693_v20 = vsel %vm565_vm7, 0.9, %v2635_v8  ;;  %v2988_v21 = vsel %vm566_vm8, 0.9, %v2635_v8  ;;  %v242_v57 = vld [vmem:[%s2746_s6 + $0x58] sm:$0xff] }
  0xd8   : > { %vm1441_vm3 = vmand %vm1149_vm2, %vm1274_vm1  ;;  %v2992_v28 = vmul.f32 %v1826_v63, %v698_v10  ;;  %v2994_v29 = vmul.f32 %v1827_v0, %v699_v13  ;;  %v3000_v33 = vsel %vm567_vm9, 0.9, %v2635_v8  ;;  %v3006_v34 = vsel %vm568_vm10, 0.9, %v2635_v8  ;;  %v244_v63 = vld [vmem:[%s2746_s6 + $0x68] sm:$0xff] }
  0xd9   : > { %vm3012_vm4 = vmand %vm1114_vm15, %vm1274_vm1  ;;  %v3016_v42 = vmul.f32 %v1828_v2, %v700_v17  ;;  %vm1565_vm5 = vcmp.gt.f32.partialorder %v693_v20, 0.0  ;;  %vm1113_vm8 = vcmp.eq.s32.totalorder %v2957_v62, 1  ;;  %v3026_v14 = vmul.f32 %v1821_v6, %v693_v20 }
  0xda   : > { %vm3021_vm9 = vmand %vm1441_vm3, %vm1569_vm12  ;;  %v3029_v43 = vmul.f32 %v1822_v3, %v2988_v21  ;;  %v3032_v45 = vmul.f32 %v1823_v15, %v3000_v33  ;;  %v3035_v46 = vmul.f32 %v1824_v16, %v3006_v34  ;;  %vm1568_vm12 = vcmp.gt.f32.partialorder %v3006_v34, 0.0  ;;  %v3112_v10 = vpop.permute.xlu1 %1027  ;;  %v480_v13 = vpop.permute.xlu0 %479 }
  0xdb   : > { %vm3040_vm1 = vmand %vm3012_vm4, %vm1570_vm13  ;;  %vm573_vm3 = vcmp.eq.s32.totalorder %v2826_v4, %v477_v40  ;;  %vm574_vm10 = vcmp.eq.s32.totalorder %v2837_v11, %v477_v40  ;;  %vm575_vm7 = vcmp.eq.s32.totalorder %v2840_v12, %v477_v40  ;;  %v2081_v55 = vsel %vm3021_vm9, %v2978_v19, 0.0 }
  0xdc   : > { %vm3056_vm13 = vmand %vm3012_vm4, %vm1571_vm14  ;;  %vm576_vm15 = vcmp.eq.s32.totalorder %v2858_v22, %v477_v40  ;;  %v3068_v58 = vsel %vm573_vm3, 0.9, %v2635_v8  ;;  %v3073_v59 = vsel %vm574_vm10, 0.9, %v2635_v8  ;;  %v2082_v61 = vsel %vm3040_vm1, %v2992_v28, 0.0 }
  0xdd   : > { %vm3078_vm14 = vmand %vm3012_vm4, %vm1572_vm0  ;;  %v3091_v0 = vsel %vm575_vm7, 0.9, %v2635_v8  ;;  %v3096_v2 = vsel %vm576_vm15, 0.9, %v2635_v8  ;;  %v829_v6 = vsel %vm573_vm3, -0.105360515, %v6225_v44 }
  0xde   : > { %vm1145_vm0 = vmand %vm1113_vm8, %vm6227_vm6  ;;  %v830_v9 = vsel %vm574_vm10, -0.105360515, %v6225_v44  ;;  %v831_v3 = vsel %vm575_vm7, -0.105360515, %v6225_v44  ;;  %v832_v15 = vsel %vm576_vm15, -0.105360515, %v6225_v44  ;;  %v1829_v17 = vsub.f32 %v829_v6, %v239_v50  ;;  %v483_v16 = vpop.permute.xlu0 %482 }
  0xdf   : > { %vm1437_vm2 = vmand %vm1145_vm0, %vm1273_vm11  ;;  %v1830_v41 = vsub.f32 %v830_v9, %v240_v51  ;;  %v1831_v5 = vsub.f32 %v831_v3, %v241_v53  ;;  %v1832_v40 = vsub.f32 %v832_v15, %v242_v57  ;;  %vm1116_vm15 = vcmp.eq.s32.totalorder %v3112_v10, 1  ;;  %v246_v3 = vld [vmem:[%s2746_s6 + $0x78] sm:$0xff]  ;;  %v3235_v53 = vpop.permute.xlu1 %1030 }
  0xe0   : > { %vm3128_vm4 = vmand %vm1113_vm8, %vm1273_vm11  ;;  %vm577_vm11 = vcmp.eq.s32.totalorder %v2826_v4, %v480_v13  ;;  %vm578_vm8 = vcmp.eq.s32.totalorder %v2837_v11, %v480_v13  ;;  %vm579_vm0 = vcmp.eq.s32.totalorder %v2840_v12, %v480_v13  ;;  %vm6255_vm10 = vcmp.gt.f32.partialorder %v2988_v21, 0.0  ;;  %v243_v21 = vld [vmem:[%s2746_s6 + $0x60] sm:$0xff] }
  0xe1   : > { %vm3134_vm7 = vmand %vm1437_vm2, %vm1565_vm5  ;;  %v3154_v20 = vmul.f32 %v1829_v17, %v3068_v58  ;;  %v3157_v50 = vmul.f32 %v1830_v41, %v3073_v59  ;;  %v3160_v51 = vmul.f32 %v1831_v5, %v3091_v0  ;;  %vm1276_vm5 = vcmp.lt.s32.totalorder %v2864_v24, 300  ;;  %v245_v5 = vld [vmem:[%s2746_s6 + $0x70] sm:$0xff] }
  0xe2   : > { %vm3146_vm3 = vmand %vm3128_vm4, %vm6255_vm10  ;;  %v2077_v62 = vsel %vm3134_vm7, %v3026_v14, 0.0  ;;  %vm6258_vm2 = vcmp.gt.f32.partialorder %v3000_v33, 0.0  ;;  %v3176_v57 = vmul.f32 %v1832_v40, %v3096_v2  ;;  %vm580_vm7 = vcmp.eq.s32.totalorder %v2858_v22, %v480_v13 }
  0xe3   : > { %vm3168_vm10 = vmand %vm3128_vm4, %vm6258_vm2  ;;  %v2078_v14 = vsel %vm3146_vm3, %v3029_v43, 0.0  ;;  %v3184_v33 = vsel %vm577_vm11, 0.9, %v2635_v8  ;;  %v3201_v15 = vsel %vm578_vm8, 0.9, %v2635_v8  ;;  %vm6277_vm9 = vcmp.gt.f32.partialorder %v3096_v2, 0.0  ;;  %v3370_v10 = vpop.permute.xlu1 %1033 }
  0xe4   : > { %vm3190_vm2 = vmand %vm3128_vm4, %vm1568_vm12  ;;  %v2079_v43 = vsel %vm3168_vm10, %v3032_v45, 0.0  ;;  %v2206_v9 = vadd.f32 %v2078_v14, %v2077_v62  ;;  %v3206_v34 = vsel %vm579_vm0, 0.9, %v2635_v8  ;;  %vm6263_vm12 = vcmp.eq.s32.totalorder %v3008_v39, 1  ;;  %v252_v14 = vld [vmem:[%s2746_s6 + $0xa8] sm:$0xff] }
  0xe5   : > { %v2080_v17 = vsel %vm3190_vm2, %v3035_v46, 0.0  ;;  %vm1153_vm4 = vmand %vm6263_vm12, %vm6227_vm6  ;;  %v3218_v45 = vsel %vm580_vm7, 0.9, %v2635_v8  ;;  %v833_v41 = vsel %vm577_vm11, -0.105360515, %v6225_v44  ;;  %vm6264_vm10 = vcmp.lt.s32.totalorder %v2861_v23, 300 }
  0xe6   : > { %v2207_v40 = vadd.f32 %v2206_v9, %v2079_v43  ;;  %vm1445_vm2 = vmand %vm1153_vm4, %vm6264_vm10  ;;  %v834_v46 = vsel %vm578_vm8, -0.105360515, %v6225_v44  ;;  %v835_v18 = vsel %vm579_vm0, -0.105360515, %v6225_v44  ;;  %v836_v62 = vsel %vm580_vm7, -0.105360515, %v6225_v44 }
  0xe7   : > { %vm6265_vm11 = vmmov %vm6264_vm10  ;;  %vm1578_vm8 = vcmp.gt.f32.partialorder %v3201_v15, 0.0  ;;  %vm1579_vm4 = vcmp.gt.f32.partialorder %v3206_v34, 0.0  ;;  %v1833_v6 = vsub.f32 %v833_v41, %v243_v21  ;;  %vm6268_vm7 = vcmp.gt.f32.partialorder %v3068_v58, 0.0  ;;  %v249_v41 = vld [vmem:[%s2746_s6 + $0x90] sm:$0xff] }
  0xe8   : > { %vm3241_vm3 = vmand %vm6263_vm12, %vm6265_vm11  ;;  %v2208_v43 = vadd.f32 %v2207_v40, %v2080_v17  ;;  %v1834_v23 = vsub.f32 %v834_v46, %v244_v63  ;;  %v1835_v39 = vsub.f32 %v835_v18, %v245_v5  ;;  %v1836_v9 = vsub.f32 %v836_v62, %v246_v3  ;;  %v247_v5 = vld [vmem:[%s2746_s6 + $0x80] sm:$0xff]  ;;  %v248_v17 = vld [vmem:[%s2746_s6 + $0x88] sm:$0xff] }
  0xe9   : > { %vm3250_vm10 = vmand %vm1445_vm2, %vm6268_vm7  ;;  %vm6271_vm11 = vcmp.gt.f32.partialorder %v3073_v59, 0.0  ;;  %v3266_v21 = vmul.f32 %v1833_v6, %v3184_v33  ;;  %vm581_vm0 = vcmp.eq.s32.totalorder %v2826_v4, %v483_v16  ;;  %vm583_vm2 = vcmp.eq.s32.totalorder %v2840_v12, %v483_v16  ;;  %v250_v40 = vld [vmem:[%s2746_s6 + $0x98] sm:$0xff] }
  0xea   : > { %vm3258_vm12 = vmand %vm3241_vm3, %vm6271_vm11  ;;  %v2085_v58 = vsel %vm3250_vm10, %v3154_v20, 0.0  ;;  %v2209_v59 = vadd.f32 %v2208_v43, %v2081_v55  ;;  %vm6274_vm11 = vcmp.gt.f32.partialorder %v3091_v0, 0.0  ;;  %v3287_v35 = vmul.f32 %v1834_v23, %v3201_v15  ;;  %v3292_v55 = vpop.permute.xlu0 %485 }
  0xeb   : > { %vm3279_vm10 = vmand %vm3241_vm3, %vm6274_vm11  ;;  %v2086_v63 = vsel %vm3258_vm12, %v3157_v50, 0.0  ;;  %v3290_v19 = vmul.f32 %v1835_v39, %v3206_v34  ;;  %v3306_v50 = vmul.f32 %v1836_v9, %v3218_v45  ;;  %vm582_vm12 = vcmp.eq.s32.totalorder %v2837_v11, %v483_v16 }
  0xec   : > { %vm3298_vm11 = vmand %vm3241_vm3, %vm6277_vm9  ;;  %v2087_v44 = vsel %vm3279_vm10, %v3160_v51, 0.0  ;;  %v2210_v2 = vadd.f32 %v2209_v59, %v2082_v61  ;;  %vm584_vm9 = vcmp.eq.s32.totalorder %v2858_v22, %v483_v16  ;;  %v709_v49 = vsel %vm581_vm0, 0.9, %v2635_v8 }
  0xed   : > { %v2088_v3 = vsel %vm3298_vm11, %v3176_v57, 0.0  ;;  %vm1157_vm3 = vmand %vm1116_vm15, %vm6227_vm6  ;;  %v710_v28 = vsel %vm582_vm12, 0.9, %v2635_v8  ;;  %v711_v61 = vsel %vm583_vm2, 0.9, %v2635_v8  ;;  %v6280_v18 = vsel %vm3056_vm13, %v2994_v29, 0.0 }
  0xee   : > { %vm1449_vm1 = vmand %vm1157_vm3, %vm1276_vm5  ;;  %v3338_v46 = vsel %vm584_vm9, 0.9, %v2635_v8  ;;  %v2211_v62 = vadd.f32 %v2210_v2, %v6280_v18  ;;  %v6283_v6 = vmov -8.536996   ;;  %vm6284_vm13 = vcmp.gt.f32.partialorder %v3184_v33, 0.0 }
  0xef   : > { %vm3350_vm3 = vmand %vm1116_vm15, %vm1276_vm5  ;;  %v837_v43 = vsel %vm581_vm0, -0.105360515, %v6283_v6  ;;  %v838_v13 = vsel %vm582_vm12, -0.105360515, %v6283_v6  ;;  %v839_v29 = vsel %vm583_vm2, -0.105360515, %v6283_v6  ;;  %vm587_vm12 = vcmp.eq.s32.totalorder %v2840_v12, %v3292_v55 }
  0xf0   : > { %vm3365_vm7 = vmand %vm1449_vm1, %vm6284_vm13  ;;  %v840_v54 = vsel %vm584_vm9, -0.105360515, %v6283_v6  ;;  %vm1581_vm15 = vcmp.gt.f32.partialorder %v709_v49, 0.0  ;;  %vm1582_vm5 = vcmp.gt.f32.partialorder %v710_v28, 0.0  ;;  %vm1583_vm6 = vcmp.gt.f32.partialorder %v711_v61, 0.0 }
  0xf1   : > { %v6287_v23 = vsel %vm3078_vm14, %v3016_v42, 0.0  ;;  %vm3380_vm0 = vmand %vm3350_vm3, %vm1578_vm8  ;;  %v2089_v16 = vsel %vm3365_vm7, %v3266_v21, 0.0  ;;  %v1837_v9 = vsub.f32 %v837_v43, %v247_v5  ;;  %v1838_v15 = vsub.f32 %v838_v13, %v248_v17  ;;  %v253_v43 = vld [vmem:[%s2746_s6 + $0xb0] sm:$0xff]  ;;  %v254_v13 = vld [vmem:[%s2746_s6 + $0xb8] sm:$0xff] }
  0xf2   : > { %v2212_v39 = vadd.f32 %v2211_v62, %v6287_v23  ;;  %vm3393_vm14 = vmand %vm3350_vm3, %vm1579_vm4  ;;  %v2090_v60 = vsel %vm3380_vm0, %v3287_v35, 0.0  ;;  %v1839_v21 = vsub.f32 %v839_v29, %v249_v41  ;;  %v1840_v59 = vsub.f32 %v840_v54, %v250_v40  ;;  %v3414_v35 = vpop.permute.xlu0 %488  ;;  %v251_v62 = vld [vmem:[%s2746_s6 + $0xa0] sm:$0xff] }
  0xf3   : > { %vm6292_vm8 = vcmp.gt.f32.partialorder %v3218_v45, 0.0  ;;  %v2091_v2 = vsel %vm3393_vm14, %v3290_v19, 0.0  ;;  %v3411_v18 = vmul.f32 %v1837_v9, %v709_v49  ;;  %vm6295_vm9 = vcmp.ne.s32.totalorder %v2826_v4, 0 }
  0xf4   : > { %v2213_v5 = vadd.f32 %v2212_v39, %v2085_v58  ;;  %vm3404_vm7 = vmand %vm3350_vm3, %vm6292_vm8  ;;  %vm6296_vm1 = vcmp.eq.s32.totalorder %v3235_v53, 1  ;;  %v3423_v58 = vmul.f32 %v1838_v15, %v710_v28  ;;  %v3425_v17 = vmul.f32 %v1839_v21, %v711_v61  ;;  %v1037_v15 = vpop.permute.xlu1 %1036 }
  0xf5   : > { %v2092_v45 = vsel %vm3404_vm7, %v3306_v50, 0.0  ;;  %vm1161_vm3 = vmand %vm6296_vm1, %vm6295_vm9  ;;  %v3428_v41 = vmul.f32 %v1840_v59, %v3338_v46  ;;  %vm6297_vm13 = vcmp.lt.s32.totalorder %v2867_v25, 300  ;;  %vm586_vm8 = vcmp.eq.s32.totalorder %v2837_v11, %v3292_v55 }
  0xf6   : > { %v2214_v40 = vadd.f32 %v2213_v5, %v2086_v63  ;;  %vm1453_vm0 = vmand %vm1161_vm3, %vm6297_vm13  ;;  %vm588_vm9 = vcmp.eq.s32.totalorder %v2858_v22, %v3292_v55  ;;  %vm6299_vm4 = vcmp.eq.s32.totalorder %v3235_v53, 1  ;;  %vm6302_vm3 = vcmp.eq.s32.totalorder %v2826_v4, %v3292_v55  ;;  %v492_v50 = vpop.permute.xlu0 %491 }
  0xf7   : > { %vm6298_vm1 = vmmov %vm6297_vm13  ;;  %v713_v29 = vsel %vm6302_vm3, 0.9, %v2635_v8  ;;  %v714_v24 = vsel %vm586_vm8, 0.9, %v2635_v8  ;;  %v715_v25 = vsel %vm587_vm12, 0.9, %v2635_v8 }
  0xf8   : > { %vm3444_vm2 = vmand %vm6299_vm4, %vm6298_vm1  ;;  %v2215_v53 = vadd.f32 %v2214_v40, %v2087_v44  ;;  %v716_v23 = vsel %vm588_vm9, 0.9, %v2635_v8  ;;  %v842_v20 = vsel %vm586_vm8, -0.105360515, %v6283_v6  ;;  %v843_v49 = vsel %vm587_vm12, -0.105360515, %v6283_v6  ;;  %v1040_v34 = vpop.permute.xlu1 %1039 }
  0xf9   : > { %vm3466_vm13 = vmand %vm1453_vm0, %vm1581_vm15  ;;  %v844_v28 = vsel %vm588_vm9, -0.105360515, %v6283_v6  ;;  %vm1585_vm15 = vcmp.gt.f32.partialorder %v713_v29, 0.0  ;;  %vm6310_vm9 = vcmp.gt.f32.partialorder %v3338_v46, 0.0  ;;  %v1842_v61 = vsub.f32 %v842_v20, %v252_v14 }
  0xfa   : > { %vm6305_vm1 = vmmov %vm6302_vm3  ;;  %v2093_v44 = vsel %vm3466_vm13, %v3411_v18, 0.0  ;;  %v2216_v33 = vadd.f32 %v2215_v53, %v2088_v3  ;;  %vm6313_vm3 = vcmp.ne.s32.totalorder %v2826_v4, 0  ;;  %v1843_v46 = vsub.f32 %v843_v49, %v253_v43 }
  0xfb   : > { %v841_v39 = vsel %vm6305_vm1, -0.105360515, %v6283_v6  ;;  %vm3482_vm10 = vmand %vm3444_vm2, %vm1582_vm5  ;;  %v1844_v5 = vsub.f32 %v844_v28, %v254_v13  ;;  %vm590_vm8 = vcmp.eq.s32.totalorder %v2837_v11, %v3414_v35  ;;  %v255_v13 = vld [vmem:[%s2746_s6 + $0xc0] sm:$0xff]  ;;  %vm6333_vm7 = vcmp.ne.s32.totalorder %v2826_v4, 0 }
  0xfc   : > { %vm3505_vm0 = vmand %vm3444_vm2, %vm1583_vm6  ;;  %v2094_v55 = vsel %vm3482_vm10, %v3423_v58, 0.0  ;;  %v1841_v3 = vsub.f32 %v841_v39, %v251_v62  ;;  %v2217_v21 = vadd.f32 %v2216_v33, %v2089_v16  ;;  %v3534_v62 = vmul.f32 %v1842_v61, %v714_v24  ;;  %v258_v33 = vld [vmem:[%s2746_s6 + $0xd8] sm:$0xff] }
  0xfd   : > { %vm3516_vm11 = vmand %vm3444_vm2, %vm6310_vm9  ;;  %v2095_v0 = vsel %vm3505_vm0, %v3425_v17, 0.0  ;;  %vm6314_vm2 = vcmp.eq.s32.totalorder %v3370_v10, 1  ;;  %vm6315_vm9 = vcmp.lt.s32.totalorder %v2870_v26, 300  ;;  %vm1119_vm6 = vcmp.eq.s32.totalorder %v1037_v15, 1  ;;  %v256_v26 = vld [vmem:[%s2746_s6 + $0xc8] sm:$0xff]  ;;  %v257_v10 = vld [vmem:[%s2746_s6 + $0xd0] sm:$0xff] }
  0xfe   : > { %v2096_v59 = vsel %vm3516_vm11, %v3428_v41, 0.0  ;;  %vm1165_vm1 = vmand %vm6314_vm2, %vm6313_vm3  ;;  %v3532_v40 = vmul.f32 %v1841_v3, %v713_v29  ;;  %v2218_v16 = vadd.f32 %v2217_v21, %v2090_v60  ;;  %v3546_v63 = vmul.f32 %v1843_v46, %v715_v25  ;;  %v495_v41 = vpop.permute.xlu0 %494 }
  0xff   : > { %vm1457_vm5 = vmand %vm1165_vm1, %vm6315_vm9  ;;  %v3548_v43 = vmul.f32 %v1844_v5, %v716_v23  ;;  %v718_v39 = vsel %vm590_vm8, 0.9, %v2635_v8  ;;  %v846_v3 = vsel %vm590_vm8, -0.105360515, %v6283_v6  ;;  %vm593_vm13 = vcmp.eq.s32.totalorder %v2826_v4, %v492_v50 }
 0x100   : > { %vm6316_vm12 = vmmov %vm6315_vm9  ;;  %v2219_v20 = vadd.f32 %v2218_v16, %v2091_v2  ;;  %v1846_v16 = vsub.f32 %v846_v3, %v256_v26  ;;  %v260_v26 = vld [vmem:[%s2746_s6 + $0xe8] sm:$0xff]  ;;  %vm6228_vm10 = vcmp.eq.s32.totalorder %v2840_v12, %v492_v50  ;;  %vm6353_vm11 = vcmp.lt.s32.totalorder %v2878_v30, 300  ;;  %v265_v2 = vld [vmem:[%s2746_s6 + $0x110] sm:$0xff] }
 0x101   : > { %vm6317_vm4 = vmmov %vm6314_vm2  ;;  %vm591_vm2 = vcmp.eq.s32.totalorder %v2840_v12, %v3414_v35  ;;  %v723_v17 = vsel %vm6228_vm10, 0.9, %v2635_v8 }
 0x102   : > { %vm3542_vm3 = vmand %vm6317_vm4, %vm6316_vm12  ;;  %vm592_vm4 = vcmp.eq.s32.totalorder %v2858_v22, %v3414_v35  ;;  %vm6322_vm12 = vcmp.eq.s32.totalorder %v2826_v4, %v3414_v35  ;;  %v719_v29 = vsel %vm591_vm2, 0.9, %v2635_v8  ;;  %v2220_v61 = vadd.f32 %v2219_v20, %v2092_v45  ;;  %v498_v21 = vpop.permute.xlu0 %497 }
 0x103   : > { %vm3554_vm1 = vmand %vm1457_vm5, %vm1585_vm15  ;;  %v717_v53 = vsel %vm6322_vm12, 0.9, %v2635_v8  ;;  %vm6323_vm15 = vcmp.gt.f32.partialorder %v714_v24, 0.0  ;;  %v720_v42 = vsel %vm592_vm4, 0.9, %v2635_v8  ;;  %v3666_v54 = vmul.f32 %v1846_v16, %v718_v39 }
 0x104   : > { %vm3581_vm5 = vmand %vm3542_vm3, %vm6323_vm15  ;;  %v2097_v28 = vsel %vm3554_vm1, %v3532_v40, 0.0  ;;  %v848_v5 = vsel %vm592_vm4, -0.105360515, %v6283_v6  ;;  %v2221_v35 = vadd.f32 %v2220_v61, %v2093_v44  ;;  %vm6334_vm4 = vcmp.lt.s32.totalorder %v2873_v27, 300 }
 0x105   : > { %vm6326_vm14 = vmmov %vm6322_vm12  ;;  %vm6327_vm12 = vcmp.gt.f32.partialorder %v715_v25, 0.0  ;;  %v2098_v24 = vsel %vm3581_vm5, %v3534_v62, 0.0  ;;  %v847_v25 = vsel %vm591_vm2, -0.105360515, %v6283_v6  ;;  %v1848_v20 = vsub.f32 %v848_v5, %v258_v33  ;;  %v262_v5 = vld [vmem:[%s2746_s6 + $0xf8] sm:$0xff] }
 0x106   : > { %v845_v19 = vsel %vm6326_vm14, -0.105360515, %v6283_v6  ;;  %vm3601_vm15 = vmand %vm3542_vm3, %vm6327_vm12  ;;  %vm6330_vm12 = vcmp.gt.f32.partialorder %v716_v23, 0.0  ;;  %v1847_v14 = vsub.f32 %v847_v25, %v257_v10  ;;  %vm594_vm2 = vcmp.eq.s32.totalorder %v2837_v11, %v492_v50 }
 0x107   : > { %vm3623_vm9 = vmand %vm3542_vm3, %vm6330_vm12  ;;  %v2099_v46 = vsel %vm3601_vm15, %v3546_v63, 0.0  ;;  %v1845_v23 = vsub.f32 %v845_v19, %v255_v13  ;;  %v2222_v18 = vadd.f32 %v2221_v35, %v2094_v55  ;;  %v3670_v15 = vmul.f32 %v1848_v20, %v720_v42  ;;  %v259_v55 = vld [vmem:[%s2746_s6 + $0xe0] sm:$0xff]  ;;  %v261_v19 = vld [vmem:[%s2746_s6 + $0xf0] sm:$0xff] }
 0x108   : > { %vm1169_vm3 = vmand %vm1119_vm6, %vm6333_vm7  ;;  %v3668_v44 = vmul.f32 %v1847_v14, %v719_v29  ;;  %v721_v10 = vsel %vm593_vm13, 0.9, %v2635_v8  ;;  %v722_v3 = vsel %vm594_vm2, 0.9, %v2635_v8  ;;  %vm6347_vm0 = vcmp.gt.f32.partialorder %v720_v42, 0.0 }
 0x109   : > { %vm1461_vm8 = vmand %vm1169_vm3, %vm6334_vm4  ;;  %v3653_v13 = vmul.f32 %v1845_v23, %v717_v53  ;;  %vm6338_vm3 = vcmp.gt.f32.partialorder %v717_v53, 0.0  ;;  %v2223_v53 = vadd.f32 %v2222_v18, %v2095_v0  ;;  %v849_v25 = vsel %vm593_vm13, -0.105360515, %v6283_v6  ;;  %v1043_v23 = vpop.permute.xlu1 %1042 }
 0x10a   : > { %vm6335_vm14 = vmmov %vm6334_vm4  ;;  %v850_v45 = vsel %vm594_vm2, -0.105360515, %v6283_v6  ;;  %vm6352_vm13 = vcmp.eq.s32.totalorder %v2840_v12, %v492_v50  ;;  %v1849_v14 = vsub.f32 %v849_v25, %v259_v55  ;;  %vm1121_vm1 = vcmp.eq.s32.totalorder %v1043_v23, 1 }
 0x10b   : > { %vm3649_vm7 = vmand %vm1119_vm6, %vm6335_vm14  ;;  %vm6341_vm6 = vcmp.gt.f32.partialorder %v718_v39, 0.0  ;;  %v2224_v42 = vadd.f32 %v2223_v53, %v2096_v59  ;;  %v851_v57 = vsel %vm6352_vm13, -0.105360515, %v6283_v6  ;;  %v1850_v20 = vsub.f32 %v850_v45, %v260_v26  ;;  %v264_v26 = vld [vmem:[%s2746_s6 + $0x108] sm:$0xff] }
 0x10c   : > { %vm3662_vm4 = vmand %vm1461_vm8, %vm6338_vm3  ;;  %vm596_vm8 = vcmp.eq.s32.totalorder %v2858_v22, %v492_v50  ;;  %v1851_v50 = vsub.f32 %v851_v57, %v261_v19  ;;  %vm6368_vm15 = vcmp.ne.s32.totalorder %v2826_v4, 0 }
 0x10d   : > { %vm3675_vm14 = vmand %vm3649_vm7, %vm6341_vm6  ;;  %v2101_v58 = vsel %vm3662_vm4, %v3653_v13, 0.0  ;;  %vm6344_vm6 = vcmp.gt.f32.partialorder %v719_v29, 0.0  ;;  %v724_v29 = vsel %vm596_vm8, 0.9, %v2635_v8  ;;  %v852_v59 = vsel %vm596_vm8, -0.105360515, %v6283_v6  ;;  %v1046_v16 = vpop.permute.xlu1 %1045 }
 0x10e   : > { %vm3697_vm12 = vmand %vm3649_vm7, %vm6344_vm6  ;;  %v2102_v33 = vsel %vm3675_vm14, %v3666_v54, 0.0  ;;  %v2225_v35 = vadd.f32 %v2224_v42, %v2097_v28  ;;  %v1852_v60 = vsub.f32 %v852_v59, %v262_v5  ;;  %v3777_v28 = vmul.f32 %v1849_v14, %v721_v10 }
 0x10f   : > { %vm3714_vm6 = vmand %vm3649_vm7, %vm6347_vm0  ;;  %v2103_v0 = vsel %vm3697_vm12, %v3668_v44, 0.0  ;;  %vm6350_vm7 = vcmp.ne.s32.totalorder %v2826_v4, 0  ;;  %vm6351_vm0 = vcmp.eq.s32.totalorder %v1040_v34, 1  ;;  %v3779_v34 = vmul.f32 %v1850_v20, %v722_v3 }
 0x110   : > { %v2104_v61 = vsel %vm3714_vm6, %v3670_v15, 0.0  ;;  %vm1173_vm10 = vmand %vm6351_vm0, %vm6350_vm7  ;;  %vm1594_vm6 = vcmp.gt.f32.partialorder %v722_v3, 0.0  ;;  %vm1595_vm7 = vcmp.gt.f32.partialorder %v723_v17, 0.0  ;;  %v2226_v30 = vadd.f32 %v2225_v35, %v2098_v24  ;;  %v263_v24 = vld [vmem:[%s2746_s6 + $0x100] sm:$0xff] }
 0x111   : > { %vm1465_vm3 = vmand %vm1173_vm10, %vm6353_vm11  ;;  %vm6358_vm10 = vcmp.gt.f32.partialorder %v721_v10, 0.0  ;;  %v3781_v55 = vmul.f32 %v1851_v50, %v723_v17  ;;  %v3791_v49 = vmul.f32 %v1852_v60, %v724_v29  ;;  %v6369_v5 = vsel %vm3623_vm9, %v3548_v43, 0.0  ;;  %v1049_v9 = vpop.permute.xlu1 %1048 }
 0x112   : > { %vm6354_vm2 = vmmov %vm6353_vm11  ;;  %vm6231_vm11 = vcmp.eq.s32.totalorder %v2826_v4, %v495_v41  ;;  %v2227_v53 = vadd.f32 %v2226_v30, %v2099_v46  ;;  %v266_v46 = vld [vmem:[%s2746_s6 + $0x118] sm:$0xff]  ;;  %vm6233_vm14 = vcmp.eq.s32.totalorder %v2840_v12, %v498_v21  ;;  %vm6387_vm4 = vcmp.lt.s32.totalorder %v2884_v32, 300 }
 0x113   : > { %vm6355_vm13 = vmmov %vm6351_vm0  ;;  %vm598_vm0 = vcmp.eq.s32.totalorder %v2837_v11, %v495_v41  ;;  %v725_v10 = vsel %vm6231_vm11, 0.9, %v2635_v8 }
 0x114   : > { %vm3756_vm12 = vmand %vm6355_vm13, %vm6354_vm2  ;;  %vm600_vm13 = vcmp.eq.s32.totalorder %v2858_v22, %v495_v41  ;;  %v726_v25 = vsel %vm598_vm0, 0.9, %v2635_v8  ;;  %v2228_v45 = vadd.f32 %v2227_v53, %v6369_v5  ;;  %v854_v35 = vsel %vm598_vm0, -0.105360515, %v6283_v6  ;;  %v267_v53 = vld [vmem:[%s2746_s6 + $0x120] sm:$0xff]  ;;  %v270_v5 = vld [vmem:[%s2746_s6 + $0x138] sm:$0xff] }
 0x115   : > { %vm3761_vm8 = vmand %vm1465_vm3, %vm6358_vm10  ;;  %vm6370_vm3 = vcmp.lt.s32.totalorder %v2881_v31, 300  ;;  %v728_v57 = vsel %vm600_vm13, 0.9, %v2635_v8  ;;  %v856_v20 = vsel %vm600_vm13, -0.105360515, %v6283_v6  ;;  %v1854_v60 = vsub.f32 %v854_v35, %v264_v26 }
 0x116   : > { %vm3773_vm2 = vmand %vm3756_vm12, %vm1594_vm6  ;;  %vm599_vm6 = vcmp.eq.s32.totalorder %v2840_v12, %v495_v41  ;;  %v2105_v3 = vsel %vm3761_vm8, %v3777_v28, 0.0  ;;  %v2229_v31 = vadd.f32 %v2228_v45, %v2101_v58  ;;  %vm1600_vm0 = vcmp.gt.f32.partialorder %v728_v57, 0.0 }
 0x117   : > { %vm3787_vm5 = vmand %vm3756_vm12, %vm1595_vm7  ;;  %vm6365_vm7 = vcmp.gt.f32.partialorder %v724_v29, 0.0  ;;  %v2106_v17 = vsel %vm3773_vm2, %v3779_v34, 0.0  ;;  %v727_v42 = vsel %vm599_vm6, 0.9, %v2635_v8  ;;  %v855_v14 = vsel %vm599_vm6, -0.105360515, %v6283_v6 }
 0x118   : > { %vm3807_vm10 = vmand %vm3756_vm12, %vm6365_vm7  ;;  %v2107_v63 = vsel %vm3787_vm5, %v3781_v55, 0.0  ;;  %v1855_v30 = vsub.f32 %v855_v14, %v265_v2  ;;  %v1856_v27 = vsub.f32 %v856_v20, %v266_v46  ;;  %vm1122_vm13 = vcmp.eq.s32.totalorder %v1046_v16, 1  ;;  %v501_v16 = vpop.permute.xlu0 %500 }
 0x119   : > { %v2108_v29 = vsel %vm3807_vm10, %v3791_v49, 0.0  ;;  %vm1177_vm12 = vmand %vm1121_vm1, %vm6368_vm15  ;;  %vm6371_vm15 = vcmp.eq.s32.totalorder %v2826_v4, %v495_v41  ;;  %v2230_v13 = vadd.f32 %v2229_v31, %v2102_v33  ;;  %v3890_v26 = vmul.f32 %v1854_v60, %v726_v25 }
 0x11a   : > { %vm1469_vm11 = vmand %vm1177_vm12, %vm6370_vm3  ;;  %v853_v59 = vsel %vm6371_vm15, -0.105360515, %v6283_v6  ;;  %vm1599_vm12 = vcmp.gt.f32.partialorder %v727_v42, 0.0  ;;  %v3899_v51 = vmul.f32 %v1855_v30, %v727_v42  ;;  %v3901_v33 = vmul.f32 %v1856_v27, %v728_v57  ;;  %v269_v42 = vld [vmem:[%s2746_s6 + $0x130] sm:$0xff] }
 0x11b   : > { %vm6372_vm9 = vmmov %vm6370_vm3  ;;  %vm1598_vm3 = vcmp.gt.f32.partialorder %v726_v25, 0.0  ;;  %v1853_v50 = vsub.f32 %v853_v59, %v263_v24  ;;  %v268_v25 = vld [vmem:[%s2746_s6 + $0x128] sm:$0xff]  ;;  %v731_v59 = vsel %vm6233_vm14, 0.9, %v2635_v8  ;;  %vm6396_vm14 = vcmp.eq.s32.totalorder %v2837_v11, %v498_v21 }
 0x11c   : > { %vm3852_vm7 = vmand %vm1121_vm1, %vm6372_vm9  ;;  %vm6375_vm1 = vcmp.gt.f32.partialorder %v725_v10, 0.0  ;;  %vm6232_vm9 = vcmp.eq.s32.totalorder %v2837_v11, %v498_v21  ;;  %v858_v15 = vsel %vm6396_vm14, -0.105360515, %v6283_v6  ;;  %vm1123_vm8 = vcmp.eq.s32.totalorder %v1049_v9, 1  ;;  %v504_v49 = vpop.permute.xlu0 %503 }
 0x11d   : > { %vm3867_vm15 = vmand %vm1469_vm11, %vm6375_vm1  ;;  %v3888_v24 = vmul.f32 %v1853_v50, %v725_v10  ;;  %v2231_v10 = vadd.f32 %v2230_v13, %v2103_v0  ;;  %vm6386_vm1 = vcmp.eq.s32.totalorder %v2826_v4, %v498_v21  ;;  %v730_v57 = vsel %vm6232_vm9, 0.9, %v2635_v8 }
 0x11e   : > { %vm3873_vm6 = vmand %vm3852_vm7, %vm1598_vm3  ;;  %v729_v44 = vsel %vm6386_vm1, 0.9, %v2635_v8  ;;  %vm6395_vm9 = vcmp.eq.s32.totalorder %v2826_v4, %v498_v21  ;;  %vm6397_vm1 = vcmp.eq.s32.totalorder %v2840_v12, %v498_v21  ;;  %v1858_v18 = vsub.f32 %v858_v15, %v268_v25 }
 0x11f   : > { %vm3884_vm11 = vmand %vm3852_vm7, %vm1599_vm12  ;;  %v2109_v2 = vsel %vm3867_vm15, %v3888_v24, 0.0  ;;  %v2110_v46 = vsel %vm3873_vm6, %v3890_v26, 0.0  ;;  %v2232_v35 = vadd.f32 %v2231_v10, %v2104_v61  ;;  %v857_v20 = vsel %vm6395_vm9, -0.105360515, %v6283_v6  ;;  %v271_v10 = vld [vmem:[%s2746_s6 + $0x140] sm:$0xff] }
 0x120   : > { %vm3895_vm3 = vmand %vm3852_vm7, %vm1600_vm0  ;;  %vm6385_vm7 = vcmp.ne.s32.totalorder %v2826_v4, 0  ;;  %v2111_v39 = vsel %vm3884_vm11, %v3899_v51, 0.0  ;;  %v859_v32 = vsel %vm6397_vm1, -0.105360515, %v6283_v6  ;;  %vm1603_vm9 = vcmp.gt.f32.partialorder %v731_v59, 0.0  ;;  %v4134_v58 = vpop.permute.xlu0 %506 }
 0x121   : > { %vm1181_vm0 = vmand %vm1122_vm13, %vm6385_vm7  ;;  %v2112_v0 = vsel %vm3895_vm3, %v3901_v33, 0.0  ;;  %vm1602_vm3 = vcmp.gt.f32.partialorder %v730_v57, 0.0  ;;  %v2233_v31 = vadd.f32 %v2232_v35, %v2105_v3  ;;  %v1857_v60 = vsub.f32 %v857_v20, %v267_v53 }
 0x122   : > { %vm3934_vm12 = vmand %vm1181_vm0, %vm6387_vm4  ;;  %v1859_v30 = vsub.f32 %v859_v32, %v269_v42  ;;  %v4006_v34 = vmul.f32 %v1858_v18, %v730_v57  ;;  %vm607_vm2 = vcmp.eq.s32.totalorder %v2840_v12, %v501_v16  ;;  %v274_v57 = vld [vmem:[%s2746_s6 + $0x158] sm:$0xff]  ;;  %vm6408_vm5 = vcmp.eq.s32.totalorder %v2837_v11, %v501_v16 }
 0x123   : > { %vm6391_vm7 = vmmov %vm6387_vm4  ;;  %vm6394_vm4 = vcmp.eq.s32.totalorder %v2858_v22, %v498_v21  ;;  %v2234_v3 = vadd.f32 %v2233_v31, %v2106_v17  ;;  %v3996_v13 = vmul.f32 %v1857_v60, %v729_v44  ;;  %v862_v15 = vsel %vm6408_vm5, -0.105360515, %v6283_v6  ;;  %v1052_v60 = vpop.permute.xlu1 %1051 }
 0x124   : > { %vm3951_vm0 = vmand %vm1122_vm13, %vm6391_vm7  ;;  %v732_v14 = vsel %vm6394_vm4, 0.9, %v2635_v8  ;;  %vm1601_vm7 = vcmp.gt.f32.partialorder %v729_v44, 0.0  ;;  %v4008_v17 = vmul.f32 %v1859_v30, %v731_v59  ;;  %v273_v44 = vld [vmem:[%s2746_s6 + $0x150] sm:$0xff]  ;;  %v734_v59 = vsel %vm6408_vm5, 0.9, %v2635_v8  ;;  %v4246_v27 = vpop.permute.xlu0 %509 }
 0x125   : > { %vm6398_vm13 = vmmov %vm6394_vm4  ;;  %vm1604_vm4 = vcmp.gt.f32.partialorder %v732_v14, 0.0  ;;  %v2235_v25 = vadd.f32 %v2234_v3, %v2107_v63  ;;  %v863_v32 = vsel %vm607_vm2, -0.105360515, %v6283_v6  ;;  %vm610_vm6 = vcmp.eq.s32.totalorder %v2837_v11, %v504_v49 }
 0x126   : > { %v860_v61 = vsel %vm6398_vm13, -0.105360515, %v6283_v6  ;;  %vm3976_vm14 = vmand %vm3934_vm12, %vm1601_vm7  ;;  %vm608_vm13 = vcmp.eq.s32.totalorder %v2858_v22, %v501_v16  ;;  %vm6423_vm11 = vcmp.ne.s32.totalorder %v2826_v4, 0 }
 0x127   : > { %vm3982_vm1 = vmand %vm3951_vm0, %vm1602_vm3  ;;  %v1860_v28 = vsub.f32 %v860_v61, %v270_v5  ;;  %vm605_vm3 = vcmp.eq.s32.totalorder %v2826_v4, %v501_v16  ;;  %v2113_v42 = vsel %vm3976_vm14, %v3996_v13, 0.0  ;;  %v272_v5 = vld [vmem:[%s2746_s6 + $0x148] sm:$0xff]  ;;  %v2236_v35 = vadd.f32 %v2235_v25, %v2108_v29 }
 0x128   : > { %vm3992_vm12 = vmand %vm3951_vm0, %vm1603_vm9  ;;  %v733_v45 = vsel %vm605_vm3, 0.9, %v2635_v8  ;;  %v2114_v55 = vsel %vm3982_vm1, %v4006_v34, 0.0  ;;  %v736_v20 = vsel %vm608_vm13, 0.9, %v2635_v8  ;;  %v1862_v18 = vsub.f32 %v862_v15, %v272_v5  ;;  %v275_v5 = vld [vmem:[%s2746_s6 + $0x160] sm:$0xff] }
 0x129   : > { %vm4002_vm7 = vmand %vm3951_vm0, %vm1604_vm4  ;;  %v4010_v53 = vmul.f32 %v1860_v28, %v732_v14  ;;  %vm6407_vm0 = vcmp.ne.s32.totalorder %v2826_v4, 0  ;;  %v2115_v62 = vsel %vm3992_vm12, %v4008_v17, 0.0  ;;  %v735_v14 = vsel %vm607_vm2, 0.9, %v2635_v8  ;;  %v4366_v28 = vpop.permute.xlu0 %512 }
 0x12a   : > { %vm1185_vm4 = vmand %vm1123_vm8, %vm6407_vm0  ;;  %vm6409_vm0 = vcmp.lt.s32.totalorder %v2891_v36, 300  ;;  %v861_v19 = vsel %vm605_vm3, -0.105360515, %v6283_v6  ;;  %v864_v61 = vsel %vm608_vm13, -0.105360515, %v6283_v6  ;;  %v2237_v36 = vadd.f32 %v2236_v35, %v2109_v2 }
 0x12b   : > { %v2116_v63 = vsel %vm4002_vm7, %v4010_v53, 0.0  ;;  %vm4050_vm9 = vmand %vm1185_vm4, %vm6409_vm0  ;;  %v1861_v31 = vsub.f32 %v861_v19, %v271_v10  ;;  %vm1606_vm3 = vcmp.gt.f32.partialorder %v734_v59, 0.0  ;;  %v1863_v16 = vsub.f32 %v863_v32, %v273_v44  ;;  %v276_v44 = vld [vmem:[%s2746_s6 + $0x168] sm:$0xff]  ;;  %v1055_v32 = vpop.permute.xlu1 %1054 }
 0x12c   : > { %vm6412_vm10 = vmmov %vm6409_vm0  ;;  %vm1607_vm0 = vcmp.gt.f32.partialorder %v735_v14, 0.0  ;;  %v1864_v30 = vsub.f32 %v864_v61, %v274_v57  ;;  %v2238_v23 = vadd.f32 %v2237_v36, %v2110_v46  ;;  %vm1124_vm13 = vcmp.eq.s32.totalorder %v1052_v60, 1  ;;  %v277_v57 = vld [vmem:[%s2746_s6 + $0x170] sm:$0xff] }
 0x12d   : > { %vm4066_vm4 = vmand %vm1123_vm8, %vm6412_vm10  ;;  %vm1605_vm8 = vcmp.gt.f32.partialorder %v733_v45, 0.0  ;;  %vm1608_vm10 = vcmp.gt.f32.partialorder %v736_v20, 0.0  ;;  %v4099_v2 = vmul.f32 %v1861_v31, %v733_v45  ;;  %vm6235_vm2 = vcmp.eq.s32.totalorder %v2826_v4, %v504_v49 }
 0x12e   : > { %vm4085_vm5 = vmand %vm4050_vm9, %vm1605_vm8  ;;  %v4108_v41 = vmul.f32 %v1862_v18, %v734_v59  ;;  %v4110_v26 = vmul.f32 %v1863_v16, %v735_v14  ;;  %v4112_v46 = vmul.f32 %v1864_v30, %v736_v20  ;;  %v2239_v3 = vadd.f32 %v2238_v23, %v2111_v39  ;;  %v278_v59 = vld [vmem:[%s2746_s6 + $0x178] sm:$0xff]  ;;  %v285_v14 = vld [vmem:[%s2746_s6 + $0x1b0] sm:$0xff] }
 0x12f   : > { %vm4095_vm15 = vmand %vm4066_vm4, %vm1606_vm3  ;;  %v2117_v25 = vsel %vm4085_vm5, %v4099_v2, 0.0  ;;  %v737_v35 = vsel %vm6235_vm2, 0.9, %v2635_v8  ;;  %vm6425_vm8 = vcmp.lt.s32.totalorder %v2894_v37, 300  ;;  %v738_v20 = vsel %vm610_vm6, 0.9, %v2635_v8 }
 0x130   : > { %vm4104_vm9 = vmand %vm4066_vm4, %vm1607_vm0  ;;  %v2118_v51 = vsel %vm4095_vm15, %v4108_v41, 0.0  ;;  %v2240_v43 = vadd.f32 %v2239_v3, %v2112_v0  ;;  %vm6429_vm2 = vcmp.eq.s32.totalorder %v2858_v22, %v504_v49  ;;  %v866_v29 = vsel %vm610_vm6, -0.105360515, %v6283_v6  ;;  %v279_v3 = vld [vmem:[%s2746_s6 + $0x180] sm:$0xff]  ;;  %v289_v16 = vld [vmem:[%s2746_s6 + $0x1d0] sm:$0xff] }
 0x131   : > { %vm4123_vm3 = vmand %vm4066_vm4, %vm1608_vm10  ;;  %v2119_v39 = vsel %vm4104_vm9, %v4110_v26, 0.0  ;;  %v740_v54 = vsel %vm6429_vm2, 0.9, %v2635_v8  ;;  %vm613_vm2 = vcmp.eq.s32.totalorder %v2826_v4, %v4134_v58  ;;  %v1866_v50 = vsub.f32 %v866_v29, %v276_v44  ;;  %v297_v18 = vld [vmem:[%s2746_s6 + $0x210] sm:$0xff] }
 0x132   : > { %v2120_v45 = vsel %vm4123_vm3, %v4112_v46, 0.0  ;;  %vm1189_vm4 = vmand %vm1124_vm13, %vm6423_vm11  ;;  %vm6428_vm11 = vcmp.eq.s32.totalorder %v2840_v12, %v504_v49  ;;  %v2241_v37 = vadd.f32 %v2240_v43, %v2113_v42  ;;  %vm6237_vm1 = vcmp.eq.s32.totalorder %v2837_v11, %v4134_v58 }
 0x133   : > { %vm4159_vm0 = vmand %vm1189_vm4, %vm6425_vm8  ;;  %v739_v19 = vsel %vm6428_vm11, 0.9, %v2635_v8  ;;  %v4221_v34 = vmul.f32 %v1866_v50, %v738_v20  ;;  %v741_v44 = vsel %vm613_vm2, 0.9, %v2635_v8  ;;  %vm6460_vm9 = vcmp.ne.s32.totalorder %v2826_v4, 0 }
 0x134   : > { %vm6430_vm10 = vmmov %vm6425_vm8  ;;  %vm6433_vm8 = vcmp.eq.s32.totalorder %v2826_v4, %v504_v49  ;;  %vm1611_vm6 = vcmp.gt.f32.partialorder %v739_v19, 0.0  ;;  %v2242_v13 = vadd.f32 %v2241_v37, %v2114_v55 }
 0x135   : > { %vm4175_vm3 = vmand %vm1124_vm13, %vm6430_vm10  ;;  %v865_v0 = vsel %vm6433_vm8, -0.105360515, %v6283_v6  ;;  %vm6435_vm13 = vcmp.eq.s32.totalorder %v2858_v22, %v504_v49  ;;  %vm1610_vm10 = vcmp.gt.f32.partialorder %v738_v20, 0.0  ;;  %vm1612_vm8 = vcmp.gt.f32.partialorder %v740_v54, 0.0  ;;  %v281_v20 = vld [vmem:[%s2746_s6 + $0x190] sm:$0xff] }
 0x136   : > { %vm6434_vm4 = vmmov %vm6428_vm11  ;;  %v868_v61 = vsel %vm6435_vm13, -0.105360515, %v6283_v6  ;;  %vm1609_vm11 = vcmp.gt.f32.partialorder %v737_v35, 0.0  ;;  %v1865_v60 = vsub.f32 %v865_v0, %v275_v5  ;;  %v2243_v55 = vadd.f32 %v2242_v13, %v2115_v62  ;;  %v280_v5 = vld [vmem:[%s2746_s6 + $0x188] sm:$0xff] }
 0x137   : > { %v867_v15 = vsel %vm6434_vm4, -0.105360515, %v6283_v6  ;;  %vm4199_vm4 = vmand %vm4159_vm0, %vm1609_vm11  ;;  %v1868_v36 = vsub.f32 %v868_v61, %v278_v59  ;;  %vm1125_vm0 = vcmp.eq.s32.totalorder %v1055_v32, 1  ;;  %vm615_vm11 = vcmp.eq.s32.totalorder %v2840_v12, %v4134_v58 }
 0x138   : > { %vm4209_vm14 = vmand %vm4175_vm3, %vm1610_vm10  ;;  %v1867_v49 = vsub.f32 %v867_v15, %v277_v57  ;;  %v4219_v21 = vmul.f32 %v1865_v60, %v737_v35  ;;  %v742_v57 = vsel %vm6237_vm1, 0.9, %v2635_v8  ;;  %v2244_v59 = vadd.f32 %v2243_v55, %v2116_v63  ;;  %v1058_v15 = vpop.permute.xlu1 %1057  ;;  %v291_v60 = vld [vmem:[%s2746_s6 + $0x1e0] sm:$0xff] }
 0x139   : > { %vm4215_vm13 = vmand %vm4175_vm3, %vm1611_vm6  ;;  %v4240_v23 = vmul.f32 %v1868_v36, %v740_v54  ;;  %vm616_vm6 = vcmp.eq.s32.totalorder %v2858_v22, %v4134_v58  ;;  %v2122_v62 = vsel %vm4209_vm14, %v4221_v34, 0.0  ;;  %v743_v40 = vsel %vm615_vm11, 0.9, %v2635_v8 }
 0x13a   : > { %vm4234_vm10 = vmand %vm4175_vm3, %vm1612_vm8  ;;  %v4238_v30 = vmul.f32 %v1867_v49, %v739_v19  ;;  %v2121_v17 = vsel %vm4199_vm4, %v4219_v21, 0.0  ;;  %vm6444_vm3 = vcmp.ne.s32.totalorder %v2826_v4, 0  ;;  %v282_v19 = vld [vmem:[%s2746_s6 + $0x198] sm:$0xff]  ;;  %v744_v63 = vsel %vm616_vm6, 0.9, %v2635_v8 }
 0x13b   : > { %vm1193_vm8 = vmand %vm1125_vm0, %vm6444_vm3  ;;  %v2124_v43 = vsel %vm4234_vm10, %v4240_v23, 0.0  ;;  %vm6445_vm3 = vcmp.lt.s32.totalorder %v2897_v38, 300  ;;  %v869_v54 = vsel %vm613_vm2, -0.105360515, %v6283_v6  ;;  %v2245_v33 = vadd.f32 %v2244_v59, %v2117_v25  ;;  %v284_v59 = vld [vmem:[%s2746_s6 + $0x1a8] sm:$0xff] }
 0x13c   : > { %v2123_v35 = vsel %vm4215_vm13, %v4238_v30, 0.0  ;;  %vm4278_vm12 = vmand %vm1193_vm8, %vm6445_vm3  ;;  %vm6451_vm8 = vcmp.eq.s32.totalorder %v2837_v11, %v4134_v58  ;;  %v871_v0 = vsel %vm615_vm11, -0.105360515, %v6283_v6  ;;  %v872_v29 = vsel %vm616_vm6, -0.105360515, %v6283_v6  ;;  %v1061_v21 = vpop.permute.xlu1 %1060 }
 0x13d   : > { %vm6448_vm7 = vmmov %vm6445_vm3  ;;  %v870_v38 = vsel %vm6451_vm8, -0.105360515, %v6283_v6  ;;  %vm1613_vm2 = vcmp.gt.f32.partialorder %v741_v44, 0.0  ;;  %vm1614_vm3 = vcmp.gt.f32.partialorder %v742_v57, 0.0  ;;  %vm1616_vm8 = vcmp.gt.f32.partialorder %v744_v63, 0.0 }
 0x13e   : > { %vm4291_vm1 = vmand %vm1125_vm0, %vm6448_vm7  ;;  %vm1615_vm7 = vcmp.gt.f32.partialorder %v743_v40, 0.0  ;;  %v1869_v2 = vsub.f32 %v869_v54, %v279_v3  ;;  %v2246_v25 = vadd.f32 %v2245_v33, %v2118_v51  ;;  %v1870_v32 = vsub.f32 %v870_v38, %v280_v5 }
 0x13f   : > { %vm4323_vm0 = vmand %vm4278_vm12, %vm1613_vm2  ;;  %v1871_v37 = vsub.f32 %v871_v0, %v281_v20  ;;  %v1872_v61 = vsub.f32 %v872_v29, %v282_v19  ;;  %vm1126_vm15 = vcmp.eq.s32.totalorder %v1058_v15, 1  ;;  %vm618_vm6 = vcmp.eq.s32.totalorder %v2837_v11, %v4246_v27  ;;  %v286_v20 = vld [vmem:[%s2746_s6 + $0x1b8] sm:$0xff] }
 0x140   : > { %vm4333_vm5 = vmand %vm4291_vm1, %vm1614_vm3  ;;  %v4343_v24 = vmul.f32 %v1869_v2, %v741_v44  ;;  %vm6238_vm12 = vcmp.eq.s32.totalorder %v2840_v12, %v4246_v27  ;;  %v2247_v41 = vadd.f32 %v2246_v25, %v2119_v39  ;;  %v4359_v50 = vmul.f32 %v1870_v32, %v742_v57  ;;  %v283_v39 = vld [vmem:[%s2746_s6 + $0x1a0] sm:$0xff]  ;;  %v288_v25 = vld [vmem:[%s2746_s6 + $0x1c8] sm:$0xff] }
 0x141   : > { %vm4339_vm11 = vmand %vm4291_vm1, %vm1615_vm7  ;;  %v4361_v13 = vmul.f32 %v1871_v37, %v743_v40  ;;  %v4363_v49 = vmul.f32 %v1872_v61, %v744_v63  ;;  %vm620_vm7 = vcmp.eq.s32.totalorder %v2858_v22, %v4246_v27  ;;  %v746_v55 = vsel %vm618_vm6, 0.9, %v2635_v8 }
 0x142   : > { %vm4355_vm2 = vmand %vm4291_vm1, %vm1616_vm8  ;;  %v2125_v26 = vsel %vm4323_vm0, %v4343_v24, 0.0  ;;  %vm6461_vm8 = vcmp.eq.s32.totalorder %v2826_v4, %v4246_v27  ;;  %v2248_v3 = vadd.f32 %v2247_v41, %v2120_v45  ;;  %v2126_v5 = vsel %vm4333_vm5, %v4359_v50, 0.0  ;;  %v1064_v24 = vpop.permute.xlu1 %1063 }
 0x143   : > { %vm1197_vm1 = vmand %vm1126_vm15, %vm6460_vm9  ;;  %v745_v36 = vsel %vm6461_vm8, 0.9, %v2635_v8  ;;  %v2127_v44 = vsel %vm4339_vm11, %v4361_v13, 0.0  ;;  %v2128_v57 = vsel %vm4355_vm2, %v4363_v49, 0.0  ;;  %vm6463_vm9 = vcmp.lt.s32.totalorder %v2916_v47, 300  ;;  %v292_v13 = vld [vmem:[%s2746_s6 + $0x1e8] sm:$0xff] }
 0x144   : > { %vm4403_vm8 = vmand %vm1197_vm1, %vm6463_vm9  ;;  %v747_v10 = vsel %vm6238_vm12, 0.9, %v2635_v8  ;;  %v748_v45 = vsel %vm620_vm7, 0.9, %v2635_v8  ;;  %vm6466_vm3 = vcmp.eq.s32.totalorder %v2826_v4, %v4246_v27  ;;  %v2249_v40 = vadd.f32 %v2248_v3, %v2121_v17  ;;  %v293_v49 = vld [vmem:[%s2746_s6 + $0x1f0] sm:$0xff] }
 0x145   : > { %v873_v19 = vsel %vm6466_vm3, -0.105360515, %v6283_v6  ;;  %vm4428_vm12 = vmand %vm1126_vm15, %vm6463_vm9  ;;  %v874_v63 = vsel %vm618_vm6, -0.105360515, %v6283_v6  ;;  %vm6469_vm3 = vcmp.eq.s32.totalorder %v2840_v12, %v4246_v27  ;;  %v876_v47 = vsel %vm620_vm7, -0.105360515, %v6283_v6 }
 0x146   : > { %v875_v31 = vsel %vm6469_vm3, -0.105360515, %v6283_v6  ;;  %vm1617_vm4 = vcmp.gt.f32.partialorder %v745_v36, 0.0  ;;  %vm1618_vm15 = vcmp.gt.f32.partialorder %v746_v55, 0.0  ;;  %vm1619_vm9 = vcmp.gt.f32.partialorder %v747_v10, 0.0 }
 0x147   : > { %vm1620_vm1 = vcmp.gt.f32.partialorder %v748_v45, 0.0  ;;  %v2250_v17 = vadd.f32 %v2249_v40, %v2122_v62  ;;  %vm4450_vm6 = vmand %vm4403_vm8, %vm1617_vm4  ;;  %v1873_v38 = vsub.f32 %v873_v19, %v283_v39  ;;  %v1874_v27 = vsub.f32 %v874_v63, %v284_v59 }
 0x148   : > { %v1875_v33 = vsub.f32 %v875_v31, %v285_v14  ;;  %vm4456_vm7 = vmand %vm4428_vm12, %vm1618_vm15  ;;  %v1876_v42 = vsub.f32 %v876_v47, %v286_v20  ;;  %vm1127_vm14 = vcmp.eq.s32.totalorder %v1061_v21, 1  ;;  %vm622_vm3 = vcmp.eq.s32.totalorder %v2837_v11, %v4366_v28 }
 0x149   : > { %v2251_v34 = vadd.f32 %v2250_v17, %v2123_v35  ;;  %vm4470_vm4 = vmand %vm4428_vm12, %vm1619_vm9  ;;  %v4474_v29 = vmul.f32 %v1873_v38, %v745_v36  ;;  %v4476_v15 = vmul.f32 %v1874_v27, %v746_v55  ;;  %v287_v35 = vld [vmem:[%s2746_s6 + $0x1c0] sm:$0xff]  ;;  %vm624_vm9 = vcmp.eq.s32.totalorder %v2858_v22, %v4366_v28  ;;  %v290_v55 = vld [vmem:[%s2746_s6 + $0x1d8] sm:$0xff] }
 0x14a   : > { %v4478_v2 = vmul.f32 %v1875_v33, %v747_v10  ;;  %vm4484_vm13 = vmand %vm4428_vm12, %vm1620_vm1  ;;  %v4488_v30 = vmul.f32 %v1876_v42, %v748_v45  ;;  %vm6478_vm8 = vcmp.eq.s32.totalorder %v2826_v4, %v4366_v28  ;;  %v750_v37 = vsel %vm622_vm3, 0.9, %v2635_v8 }
 0x14b   : > { %v749_v32 = vsel %vm6478_vm8, 0.9, %v2635_v8  ;;  %v2252_v61 = vadd.f32 %v2251_v34, %v2124_v43  ;;  %v2129_v41 = vsel %vm4450_vm6, %v4474_v29, 0.0  ;;  %v2130_v39 = vsel %vm4456_vm7, %v4476_v15, 0.0 }
 0x14c   : > { %v2131_v36 = vsel %vm4470_vm4, %v4478_v2, 0.0  ;;  %vm6479_vm12 = vcmp.ne.s32.totalorder %v2826_v4, 0  ;;  %v2132_v23 = vsel %vm4484_vm13, %v4488_v30, 0.0  ;;  %vm6480_vm10 = vcmp.lt.s32.totalorder %v2919_v48, 300 }
 0x14d   : > { %vm1201_vm1 = vmand %vm1127_vm14, %vm6479_vm12  ;;  %vm6483_vm8 = vcmp.eq.s32.totalorder %v2840_v12, %v4366_v28  ;;  %v752_v59 = vsel %vm624_vm9, 0.9, %v2635_v8  ;;  %vm1621_vm12 = vcmp.gt.f32.partialorder %v749_v32, 0.0  ;;  %v2253_v14 = vadd.f32 %v2252_v61, %v2125_v26  ;;  %v516_v26 = vpop.permute.xlu0 %515 }
 0x14e   : > { %vm4525_vm6 = vmand %vm1201_vm1, %vm6480_vm10  ;;  %v751_v3 = vsel %vm6483_vm8, 0.9, %v2635_v8  ;;  %vm6487_vm8 = vcmp.eq.s32.totalorder %v2826_v4, %v4366_v28  ;;  %v878_v9 = vsel %vm622_vm3, -0.105360515, %v6283_v6  ;;  %vm6488_vm0 = vcmp.eq.s32.totalorder %v2840_v12, %v4366_v28 }
 0x14f   : > { %vm6484_vm1 = vmmov %vm6480_vm10  ;;  %v877_v46 = vsel %vm6487_vm8, -0.105360515, %v6283_v6  ;;  %v879_v48 = vsel %vm6488_vm0, -0.105360515, %v6283_v6  ;;  %v880_v10 = vsel %vm624_vm9, -0.105360515, %v6283_v6  ;;  %v2254_v45 = vadd.f32 %v2253_v14, %v2126_v5 }
 0x150   : > { %vm4544_vm10 = vmand %vm1127_vm14, %vm6484_vm1  ;;  %vm1622_vm14 = vcmp.gt.f32.partialorder %v750_v37, 0.0  ;;  %vm1623_vm1 = vcmp.gt.f32.partialorder %v751_v3, 0.0  ;;  %vm1624_vm8 = vcmp.gt.f32.partialorder %v752_v59, 0.0  ;;  %v1877_v40 = vsub.f32 %v877_v46, %v287_v35 }
 0x151   : > { %vm4570_vm3 = vmand %vm4525_vm6, %vm1621_vm12  ;;  %v1878_v53 = vsub.f32 %v878_v9, %v288_v25  ;;  %v1879_v28 = vsub.f32 %v879_v48, %v289_v16  ;;  %v1880_v58 = vsub.f32 %v880_v10, %v290_v55  ;;  %vm1128_vm5 = vcmp.eq.s32.totalorder %v1064_v24, 1  ;;  %v519_v43 = vpop.permute.xlu0 %518 }
 0x152   : > { %vm4576_vm9 = vmand %vm4544_vm10, %vm1622_vm14  ;;  %vm6239_vm0 = vcmp.eq.s32.totalorder %v2826_v4, %v516_v26  ;;  %v2255_v50 = vadd.f32 %v2254_v45, %v2127_v44  ;;  %v4592_v31 = vmul.f32 %v1877_v40, %v749_v32  ;;  %vm6495_vm14 = vcmp.ne.s32.totalorder %v2826_v4, 0  ;;  %v303_v32 = vld [vmem:[%s2746_s6 + $0x240] sm:$0xff] }
 0x153   : > { %vm4588_vm12 = vmand %vm4544_vm10, %vm1623_vm1  ;;  %v4594_v47 = vmul.f32 %v1878_v53, %v750_v37  ;;  %v4596_v21 = vmul.f32 %v1879_v28, %v751_v3  ;;  %v4598_v17 = vmul.f32 %v1880_v58, %v752_v59  ;;  %vm627_vm1 = vcmp.eq.s32.totalorder %v2840_v12, %v516_v26  ;;  %v296_v53 = vld [vmem:[%s2746_s6 + $0x208] sm:$0xff]  ;;  %v298_v28 = vld [vmem:[%s2746_s6 + $0x218] sm:$0xff] }
 0x154   : > { %vm1205_vm11 = vmand %vm1128_vm5, %vm6495_vm14  ;;  %vm628_vm6 = vcmp.eq.s32.totalorder %v2858_v22, %v516_v26  ;;  %v753_v44 = vsel %vm6239_vm0, 0.9, %v2635_v8  ;;  %v2256_v54 = vadd.f32 %v2255_v50, %v2128_v57  ;;  %v2133_v27 = vsel %vm4570_vm3, %v4592_v31, 0.0  ;;  %v294_v57 = vld [vmem:[%s2746_s6 + $0x1f8] sm:$0xff] }
 0x155   : > { %vm4617_vm15 = vmand %vm4544_vm10, %vm1624_vm8  ;;  %v2134_v33 = vsel %vm4576_vm9, %v4594_v47, 0.0  ;;  %v2135_v51 = vsel %vm4588_vm12, %v4596_v21, 0.0  ;;  %vm6498_vm2 = vcmp.lt.s32.totalorder %v2931_v52, 300  ;;  %vm6501_vm8 = vcmp.eq.s32.totalorder %v2837_v11, %v516_v26  ;;  %v305_v47 = vld [vmem:[%s2746_s6 + $0x250] sm:$0xff] }
 0x156   : > { %v2136_v42 = vsel %vm4617_vm15, %v4598_v17, 0.0  ;;  %vm4637_vm10 = vmand %vm1205_vm11, %vm6498_vm2  ;;  %v754_v29 = vsel %vm6501_vm8, 0.9, %v2635_v8  ;;  %v755_v35 = vsel %vm627_vm1, 0.9, %v2635_v8  ;;  %vm1625_vm3 = vcmp.gt.f32.partialorder %v753_v44, 0.0 }
 0x157   : > { %v2257_v25 = vadd.f32 %v2256_v54, %v2129_v41  ;;  %vm6502_vm14 = vmmov %vm6498_vm2  ;;  %v756_v37 = vsel %vm628_vm6, 0.9, %v2635_v8  ;;  %vm6505_vm11 = vcmp.eq.s32.totalorder %v2826_v4, %v516_v26  ;;  %v1067_v41 = vpop.permute.xlu1 %1066  ;;  %v883_v52 = vsel %vm627_vm1, -0.105360515, %v6283_v6 }
 0x158   : > { %vm4650_vm0 = vmand %vm1128_vm5, %vm6502_vm14  ;;  %v881_v61 = vsel %vm6505_vm11, -0.105360515, %v6283_v6  ;;  %v884_v55 = vsel %vm628_vm6, -0.105360515, %v6283_v6  ;;  %vm1626_vm5 = vcmp.gt.f32.partialorder %v754_v29, 0.0  ;;  %vm1628_vm14 = vcmp.gt.f32.partialorder %v756_v37, 0.0 }
 0x159   : > { %vm6506_vm2 = vmmov %vm6501_vm8  ;;  %vm1627_vm8 = vcmp.gt.f32.partialorder %v755_v35, 0.0  ;;  %v2258_v3 = vadd.f32 %v2257_v25, %v2130_v39  ;;  %v1881_v14 = vsub.f32 %v881_v61, %v291_v60  ;;  %v1883_v0 = vsub.f32 %v883_v52, %v293_v49  ;;  %v522_v49 = vpop.permute.xlu0 %521 }
 0x15a   : > { %v882_v16 = vsel %vm6506_vm2, -0.105360515, %v6283_v6  ;;  %vm4675_vm11 = vmand %vm4637_vm10, %vm1625_vm3  ;;  %v1884_v9 = vsub.f32 %v884_v55, %v294_v57  ;;  %vm1129_vm1 = vcmp.eq.s32.totalorder %v1067_v41, 1  ;;  %vm629_vm3 = vcmp.eq.s32.totalorder %v2826_v4, %v519_v43 }
 0x15b   : > { %v1882_v20 = vsub.f32 %v882_v16, %v292_v13  ;;  %vm4681_vm6 = vmand %vm4650_vm0, %vm1626_vm5  ;;  %v2259_v15 = vadd.f32 %v2258_v3, %v2131_v36  ;;  %v4696_v48 = vmul.f32 %v1881_v14, %v753_v44  ;;  %v4701_v26 = vmul.f32 %v1883_v0, %v755_v35  ;;  %v295_v36 = vld [vmem:[%s2746_s6 + $0x200] sm:$0xff]  ;;  %v1070_v25 = vpop.permute.xlu1 %1069 }
 0x15c   : > { %vm4692_vm10 = vmand %vm4650_vm0, %vm1627_vm8  ;;  %v4703_v62 = vmul.f32 %v1884_v9, %v756_v37  ;;  %vm6513_vm4 = vcmp.ne.s32.totalorder %v2826_v4, 0  ;;  %vm630_vm5 = vcmp.eq.s32.totalorder %v2837_v11, %v519_v43  ;;  %vm631_vm8 = vcmp.eq.s32.totalorder %v2840_v12, %v519_v43  ;;  %v300_v9 = vld [vmem:[%s2746_s6 + $0x228] sm:$0xff] }
 0x15d   : > { %v4698_v24 = vmul.f32 %v1882_v20, %v754_v29  ;;  %vm4708_vm2 = vmand %vm1129_vm1, %vm6513_vm4  ;;  %v2260_v10 = vadd.f32 %v2259_v15, %v2132_v23  ;;  %v2137_v19 = vsel %vm4675_vm11, %v4696_v48, 0.0  ;;  %vm632_vm13 = vcmp.eq.s32.totalorder %v2858_v22, %v519_v43  ;;  %v4829_v38 = vpop.permute.xlu0 %524  ;;  %v299_v20 = vld [vmem:[%s2746_s6 + $0x220] sm:$0xff]  ;;  %v301_v15 = vld [vmem:[%s2746_s6 + $0x230] sm:$0xff] }
 0x15e   : > { %vm4722_vm7 = vmand %vm4650_vm0, %vm1628_vm14  ;;  %v2139_v30 = vsel %vm4692_vm10, %v4701_v26, 0.0  ;;  %v757_v58 = vsel %vm629_vm3, 0.9, %v2635_v8  ;;  %v758_v50 = vsel %vm630_vm5, 0.9, %v2635_v8  ;;  %vm6518_vm0 = vcmp.lt.s32.totalorder %v2943_v56, 300 }
 0x15f   : > { %v2138_v40 = vsel %vm4681_vm6, %v4698_v24, 0.0  ;;  %v2140_v23 = vsel %vm4722_vm7, %v4703_v62, 0.0  ;;  %v2261_v31 = vadd.f32 %v2260_v10, %v2133_v27  ;;  %vm4752_vm14 = vmand %vm4708_vm2, %vm6518_vm0  ;;  %v759_v13 = vsel %vm631_vm8, 0.9, %v2635_v8  ;;  %v302_v48 = vld [vmem:[%s2746_s6 + $0x238] sm:$0xff] }
 0x160   : > { %v760_v44 = vsel %vm632_vm13, 0.9, %v2635_v8  ;;  %v885_v54 = vsel %vm629_vm3, -0.105360515, %v6283_v6  ;;  %vm6521_vm11 = vmmov %vm6518_vm0  ;;  %v886_v57 = vsel %vm630_vm5, -0.105360515, %v6283_v6  ;;  %vm633_vm12 = vcmp.eq.s32.totalorder %v2826_v4, %v522_v49 }
 0x161   : > { %vm4766_vm4 = vmand %vm1129_vm1, %vm6521_vm11  ;;  %v887_v34 = vsel %vm631_vm8, -0.105360515, %v6283_v6  ;;  %v888_v29 = vsel %vm632_vm13, -0.105360515, %v6283_v6  ;;  %v1885_v35 = vsub.f32 %v885_v54, %v295_v36  ;;  %v2262_v56 = vadd.f32 %v2261_v31, %v2134_v33  ;;  %v1073_v31 = vpop.permute.xlu1 %1072 }
 0x162   : > { %vm1629_vm1 = vcmp.gt.f32.partialorder %v757_v58, 0.0  ;;  %vm1630_vm3 = vcmp.gt.f32.partialorder %v758_v50, 0.0  ;;  %vm1631_vm2 = vcmp.gt.f32.partialorder %v759_v13, 0.0  ;;  %vm1632_vm0 = vcmp.gt.f32.partialorder %v760_v44, 0.0 }
 0x163   : > { %vm4783_vm5 = vmand %vm4752_vm14, %vm1629_vm1  ;;  %v1886_v37 = vsub.f32 %v886_v57, %v296_v53  ;;  %v1887_v61 = vsub.f32 %v887_v34, %v297_v18  ;;  %v1888_v16 = vsub.f32 %v888_v29, %v298_v28  ;;  %v2263_v63 = vadd.f32 %v2262_v56, %v2135_v51 }
 0x164   : > { %vm4793_vm9 = vmand %vm4766_vm4, %vm1630_vm3  ;;  %v4797_v33 = vmul.f32 %v1885_v35, %v757_v58  ;;  %v420_v41 = vadd.s32 136, %v2823_v1  ;;  %vm1130_vm8 = vcmp.eq.s32.totalorder %v1070_v25, 1  ;;  %vm634_vm11 = vcmp.eq.s32.totalorder %v2837_v11, %v522_v49 }
 0x165   : > { %vm4802_vm13 = vmand %vm4766_vm4, %vm1631_vm2  ;;  %v4806_v5 = vmul.f32 %v1886_v37, %v758_v50  ;;  %v4808_v21 = vmul.f32 %v1887_v61, %v759_v13  ;;  %v4810_v51 = vmul.f32 %v1888_v16, %v760_v44  ;;  %v2264_v55 = vadd.f32 %v2263_v63, %v2136_v42  ;;  %v304_v37 = vld [vmem:[%s2746_s6 + $0x248] sm:$0xff]  ;;  %v4940_v61 = vpop.permute.xlu0 %527  ;;  %v1076_v36 = vpop.permute.xlu1 %1075 }
 0x166   : > { %vm4820_vm14 = vmand %vm4766_vm4, %vm1632_vm0  ;;  %v2141_v3 = vsel %vm4783_vm5, %v4797_v33, 0.0  ;;  %v454_v59 = vadd.s32 %v2831_v7, %v420_v41  ;;  %vm6532_vm15 = vcmp.ne.s32.totalorder %v2826_v4, 0  ;;  %vm635_vm1 = vcmp.eq.s32.totalorder %v2840_v12, %v522_v49  ;;  %v306_v33 = vld [vmem:[%s2746_s6 + $0x258] sm:$0xff] }
 0x167   : > { %v2142_v17 = vsel %vm4793_vm9, %v4806_v5, 0.0  ;;  %v2143_v42 = vsel %vm4802_vm13, %v4808_v21, 0.0  ;;  %v2144_v14 = vsel %vm4820_vm14, %v4810_v51, 0.0  ;;  %vm1213_vm4 = vmand %vm1130_vm8, %vm6532_vm15  ;;  %v2265_v0 = vadd.f32 %v2264_v55, %v2137_v19 }
 0x168   : > { %vm1290_vm3 = vcmp.lt.s32.totalorder %v454_v59, 300  ;;  %vm636_vm2 = vcmp.eq.s32.totalorder %v2858_v22, %v522_v49  ;;  %v761_v2 = vsel %vm633_vm12, 0.9, %v2635_v8  ;;  %v762_v10 = vsel %vm634_vm11, 0.9, %v2635_v8 }
 0x169   : > { %vm4852_vm0 = vmand %vm1213_vm4, %vm1290_vm3  ;;  %v763_v19 = vsel %vm635_vm1, 0.9, %v2635_v8  ;;  %v764_v53 = vsel %vm636_vm2, 0.9, %v2635_v8  ;;  %vm637_vm5 = vcmp.eq.s32.totalorder %v2826_v4, %v4829_v38  ;;  %v2266_v18 = vadd.f32 %v2265_v0, %v2138_v40 }
 0x16a   : > { %vm4870_vm9 = vmand %vm1130_vm8, %vm1290_vm3  ;;  %v889_v58 = vsel %vm633_vm12, -0.105360515, %v6283_v6  ;;  %v890_v50 = vsel %vm634_vm11, -0.105360515, %v6283_v6  ;;  %v891_v46 = vsel %vm635_vm1, -0.105360515, %v6283_v6  ;;  %vm638_vm3 = vcmp.eq.s32.totalorder %v2837_v11, %v4829_v38 }
 0x16b   : > { %v892_v24 = vsel %vm636_vm2, -0.105360515, %v6283_v6  ;;  %vm1633_vm6 = vcmp.gt.f32.partialorder %v761_v2, 0.0  ;;  %vm1634_vm8 = vcmp.gt.f32.partialorder %v762_v10, 0.0  ;;  %vm1635_vm15 = vcmp.gt.f32.partialorder %v763_v19, 0.0 }
 0x16c   : > { %v2267_v40 = vadd.f32 %v2266_v18, %v2139_v30  ;;  %vm1636_vm12 = vcmp.gt.f32.partialorder %v764_v53, 0.0  ;;  %vm4890_vm4 = vmand %vm4852_vm0, %vm1633_vm6  ;;  %v1889_v13 = vsub.f32 %v889_v58, %v299_v20  ;;  %v1890_v44 = vsub.f32 %v890_v50, %v300_v9 }
 0x16d   : > { %vm4896_vm11 = vmand %vm4870_vm9, %vm1634_vm8  ;;  %v1891_v49 = vsub.f32 %v891_v46, %v301_v15  ;;  %v1892_v39 = vsub.f32 %v892_v24, %v302_v48  ;;  %v421_v26 = vadd.s32 144, %v2823_v1  ;;  %vm1131_vm10 = vcmp.eq.s32.totalorder %v1073_v31, 1  ;;  %v5034_v24 = vpop.permute.xlu0 %530 }
 0x16e   : > { %v2268_v30 = vadd.f32 %v2267_v40, %v2140_v23  ;;  %vm4907_vm1 = vmand %vm4870_vm9, %vm1635_vm15  ;;  %v2017_v57 = vmul.f32 %v1889_v13, %v761_v2  ;;  %v4911_v34 = vmul.f32 %v1890_v44, %v762_v10  ;;  %vm639_vm7 = vcmp.eq.s32.totalorder %v2840_v12, %v4829_v38  ;;  %v307_v13 = vld [vmem:[%s2746_s6 + $0x260] sm:$0xff] }
 0x16f   : > { %vm4917_vm2 = vmand %vm4870_vm9, %vm1636_vm12  ;;  %v4921_v62 = vmul.f32 %v1891_v49, %v763_v19  ;;  %v4923_v23 = vmul.f32 %v1892_v39, %v764_v53  ;;  %v455_v29 = vadd.s32 %v2831_v7, %v421_v26  ;;  %vm6545_vm0 = vcmp.ne.s32.totalorder %v2826_v4, 0  ;;  %v308_v39 = vld [vmem:[%s2746_s6 + $0x268] sm:$0xff]  ;;  %v309_v26 = vld [vmem:[%s2746_s6 + $0x270] sm:$0xff] }
 0x170   : > { %v2269_v35 = vadd.f32 %v2268_v30, %v2141_v3  ;;  %v2145_v25 = vsel %vm4890_vm4, %v2017_v57, 0.0  ;;  %v2146_v56 = vsel %vm4896_vm11, %v4911_v34, 0.0  ;;  %vm1217_vm9 = vmand %vm1131_vm10, %vm6545_vm0  ;;  %vm640_vm6 = vcmp.eq.s32.totalorder %v2858_v22, %v4829_v38  ;;  %v310_v30 = vld [vmem:[%s2746_s6 + $0x278] sm:$0xff]  ;;  %v311_v10 = vld [vmem:[%s2746_s6 + $0x280] sm:$0xff] }
 0x171   : > { %v2147_v16 = vsel %vm4907_vm1, %v4921_v62, 0.0  ;;  %v2148_v63 = vsel %vm4917_vm2, %v4923_v23, 0.0  ;;  %vm1291_vm8 = vcmp.lt.s32.totalorder %v455_v29, 300  ;;  %v765_v41 = vsel %vm637_vm5, 0.9, %v2635_v8 }
 0x172   : > { %v2270_v5 = vadd.f32 %v2269_v35, %v2142_v17  ;;  %vm4954_vm15 = vmand %vm1217_vm9, %vm1291_vm8  ;;  %v766_v3 = vsel %vm638_vm3, 0.9, %v2635_v8  ;;  %v767_v59 = vsel %vm639_vm7, 0.9, %v2635_v8  ;;  %v768_v20 = vsel %vm640_vm6, 0.9, %v2635_v8 }
 0x173   : > { %vm4971_vm12 = vmand %vm1131_vm10, %vm1291_vm8  ;;  %v893_v0 = vsel %vm637_vm5, -0.105360515, %v6283_v6  ;;  %v894_v9 = vsel %vm638_vm3, -0.105360515, %v6283_v6  ;;  %v895_v15 = vsel %vm639_vm7, -0.105360515, %v6283_v6  ;;  %vm641_vm4 = vcmp.eq.s32.totalorder %v2826_v4, %v4940_v61 }
 0x174   : > { %v2271_v48 = vadd.f32 %v2270_v5, %v2143_v42  ;;  %v896_v2 = vsel %vm640_vm6, -0.105360515, %v6283_v6  ;;  %vm1637_vm5 = vcmp.gt.f32.partialorder %v765_v41, 0.0  ;;  %vm1638_vm11 = vcmp.gt.f32.partialorder %v766_v3, 0.0 }
 0x175   : > { %vm1639_vm10 = vcmp.gt.f32.partialorder %v767_v59, 0.0  ;;  %vm1640_vm1 = vcmp.gt.f32.partialorder %v768_v20, 0.0  ;;  %vm4999_vm3 = vmand %vm4954_vm15, %vm1637_vm5  ;;  %v1893_v52 = vsub.f32 %v893_v0, %v303_v32  ;;  %v1894_v19 = vsub.f32 %v894_v9, %v304_v37 }
 0x176   : > { %v2272_v21 = vadd.f32 %v2271_v48, %v2144_v14  ;;  %vm5009_vm13 = vmand %vm4971_vm12, %vm1638_vm11  ;;  %v1895_v42 = vsub.f32 %v895_v15, %v305_v47  ;;  %v1896_v53 = vsub.f32 %v896_v2, %v306_v33  ;;  %v422_v18 = vadd.s32 152, %v2823_v1  ;;  %v1079_v47 = vpop.permute.xlu1 %1078 }
 0x177   : > { %vm5016_vm7 = vmand %vm4971_vm12, %vm1639_vm10  ;;  %v2021_v43 = vmul.f32 %v1893_v52, %v765_v41  ;;  %v2022_v51 = vmul.f32 %v1894_v19, %v766_v3  ;;  %vm1132_vm14 = vcmp.eq.s32.totalorder %v1076_v36, 1  ;;  %vm642_vm0 = vcmp.eq.s32.totalorder %v2837_v11, %v4940_v61  ;;  %v5144_v52 = vpop.permute.xlu0 %533  ;;  %v315_v41 = vld [vmem:[%s2746_s6 + $0x2a0] sm:$0xff] }
 0x178   : > { %v2273_v14 = vadd.f32 %v2272_v21, %v2145_v25  ;;  %vm5025_vm9 = vmand %vm4971_vm12, %vm1640_vm1  ;;  %v5029_v50 = vmul.f32 %v1895_v42, %v767_v59  ;;  %v5031_v46 = vmul.f32 %v1896_v53, %v768_v20  ;;  %v456_v31 = vadd.s32 %v2831_v7, %v422_v18  ;;  %v312_v42 = vld [vmem:[%s2746_s6 + $0x288] sm:$0xff]  ;;  %v313_v53 = vld [vmem:[%s2746_s6 + $0x290] sm:$0xff] }
 0x179   : > { %v2149_v40 = vsel %vm4999_vm3, %v2021_v43, 0.0  ;;  %v2150_v60 = vsel %vm5009_vm13, %v2022_v51, 0.0  ;;  %vm6558_vm6 = vcmp.ne.s32.totalorder %v2826_v4, 0  ;;  %vm643_vm15 = vcmp.eq.s32.totalorder %v2840_v12, %v4940_v61  ;;  %v314_v18 = vld [vmem:[%s2746_s6 + $0x298] sm:$0xff] }
 0x17a   : > { %vm1221_vm8 = vmand %vm1132_vm14, %vm6558_vm6  ;;  %vm644_vm12 = vcmp.eq.s32.totalorder %v2858_v22, %v4940_v61  ;;  %v2274_v44 = vadd.f32 %v2273_v14, %v2146_v56  ;;  %v2151_v54 = vsel %vm5016_vm7, %v5029_v50, 0.0  ;;  %v2152_v49 = vsel %vm5025_vm9, %v5031_v46, 0.0 }
 0x17b   : > { %vm1292_vm5 = vcmp.lt.s32.totalorder %v456_v31, 300  ;;  %v769_v57 = vsel %vm641_vm4, 0.9, %v2635_v8  ;;  %v770_v34 = vsel %vm642_vm0, 0.9, %v2635_v8  ;;  %vm645_vm10 = vcmp.eq.s32.totalorder %v2826_v4, %v5034_v24 }
 0x17c   : > { %vm5057_vm11 = vmand %vm1221_vm8, %vm1292_vm5  ;;  %v771_v62 = vsel %vm643_vm15, 0.9, %v2635_v8  ;;  %v2275_v29 = vadd.f32 %v2274_v44, %v2147_v16  ;;  %v772_v25 = vsel %vm644_vm12, 0.9, %v2635_v8  ;;  %v897_v56 = vsel %vm641_vm4, -0.105360515, %v6283_v6 }
 0x17d   : > { %vm5076_vm1 = vmand %vm1132_vm14, %vm1292_vm5  ;;  %v898_v32 = vsel %vm642_vm0, -0.105360515, %v6283_v6  ;;  %v899_v37 = vsel %vm643_vm15, -0.105360515, %v6283_v6  ;;  %v900_v16 = vsel %vm644_vm12, -0.105360515, %v6283_v6  ;;  %v1897_v5 = vsub.f32 %v897_v56, %v307_v13 }
 0x17e   : > { %vm1641_vm3 = vcmp.gt.f32.partialorder %v769_v57, 0.0  ;;  %vm1642_vm13 = vcmp.gt.f32.partialorder %v770_v34, 0.0  ;;  %v2276_v33 = vadd.f32 %v2275_v29, %v2148_v63  ;;  %vm1643_vm4 = vcmp.gt.f32.partialorder %v771_v62, 0.0 }
 0x17f   : > { %vm1644_vm7 = vcmp.gt.f32.partialorder %v772_v25, 0.0  ;;  %vm5106_vm14 = vmand %vm5057_vm11, %vm1641_vm3  ;;  %v1898_v55 = vsub.f32 %v898_v32, %v308_v39  ;;  %v1899_v45 = vsub.f32 %v899_v37, %v309_v26  ;;  %v1900_v23 = vsub.f32 %v900_v16, %v310_v30  ;;  %v1082_v26 = vpop.permute.xlu1 %1081 }
 0x180   : > { %vm5112_vm0 = vmand %vm5076_vm1, %vm1642_vm13  ;;  %v423_v63 = vadd.s32 160, %v2823_v1  ;;  %v2277_v3 = vadd.f32 %v2276_v33, %v2149_v40  ;;  %v2025_v20 = vmul.f32 %v1897_v5, %v769_v57  ;;  %vm1133_vm6 = vcmp.eq.s32.totalorder %v1079_v47, 1 }
 0x181   : > { %vm5119_vm2 = vmand %vm5076_vm1, %vm1643_vm4  ;;  %vm646_vm8 = vcmp.eq.s32.totalorder %v2837_v11, %v5034_v24  ;;  %v2026_v0 = vmul.f32 %v1898_v55, %v770_v34  ;;  %v2027_v9 = vmul.f32 %v1899_v45, %v771_v62  ;;  %v5131_v15 = vmul.f32 %v1900_v23, %v772_v25  ;;  %v316_v23 = vld [vmem:[%s2746_s6 + $0x2a8] sm:$0xff] }
 0x182   : > { %vm5127_vm15 = vmand %vm5076_vm1, %vm1644_vm7  ;;  %v457_v48 = vadd.s32 %v2831_v7, %v423_v63  ;;  %v2278_v2 = vadd.f32 %v2277_v3, %v2150_v60  ;;  %v2153_v36 = vsel %vm5106_vm14, %v2025_v20, 0.0  ;;  %vm6571_vm12 = vcmp.ne.s32.totalorder %v2826_v4, 0  ;;  %v317_v63 = vld [vmem:[%s2746_s6 + $0x2b0] sm:$0xff]  ;;  %v318_v3 = vld [vmem:[%s2746_s6 + $0x2b8] sm:$0xff] }
 0x183   : > { %vm1225_vm5 = vmand %vm1133_vm6, %vm6571_vm12  ;;  %vm647_vm11 = vcmp.eq.s32.totalorder %v2840_v12, %v5034_v24  ;;  %vm648_vm1 = vcmp.eq.s32.totalorder %v2858_v22, %v5034_v24  ;;  %v2154_v19 = vsel %vm5112_vm0, %v2026_v0, 0.0  ;;  %v2155_v21 = vsel %vm5119_vm2, %v2027_v9, 0.0 }
 0x184   : > { %v2156_v38 = vsel %vm5127_vm15, %v5131_v15, 0.0  ;;  %vm1293_vm3 = vcmp.lt.s32.totalorder %v457_v48, 300  ;;  %v2279_v28 = vadd.f32 %v2278_v2, %v2151_v54  ;;  %v773_v51 = vsel %vm645_vm10, 0.9, %v2635_v8 }
 0x185   : > { %vm5156_vm13 = vmand %vm1225_vm5, %vm1293_vm3  ;;  %v774_v14 = vsel %vm646_vm8, 0.9, %v2635_v8  ;;  %v775_v50 = vsel %vm647_vm11, 0.9, %v2635_v8  ;;  %v776_v40 = vsel %vm648_vm1, 0.9, %v2635_v8  ;;  %vm649_vm7 = vcmp.eq.s32.totalorder %v2826_v4, %v5144_v52 }
 0x186   : > { %vm5173_vm4 = vmand %vm1133_vm6, %vm1293_vm3  ;;  %v901_v60 = vsel %vm645_vm10, -0.105360515, %v6283_v6  ;;  %v902_v13 = vsel %vm646_vm8, -0.105360515, %v6283_v6  ;;  %v2280_v44 = vadd.f32 %v2279_v28, %v2152_v49  ;;  %v903_v54 = vsel %vm647_vm11, -0.105360515, %v6283_v6 }
 0x187   : > { %v904_v39 = vsel %vm648_vm1, -0.105360515, %v6283_v6  ;;  %vm1645_vm10 = vcmp.gt.f32.partialorder %v773_v51, 0.0  ;;  %vm1646_vm14 = vcmp.gt.f32.partialorder %v774_v14, 0.0  ;;  %vm1647_vm0 = vcmp.gt.f32.partialorder %v775_v50, 0.0 }
 0x188   : > { %vm1648_vm2 = vcmp.gt.f32.partialorder %v776_v40, 0.0  ;;  %vm5205_vm6 = vmand %vm5156_vm13, %vm1645_vm10  ;;  %v1901_v46 = vsub.f32 %v901_v60, %v311_v10  ;;  %v2281_v49 = vadd.f32 %v2280_v44, %v2153_v36  ;;  %v1902_v24 = vsub.f32 %v902_v13, %v312_v42  ;;  %v537_v36 = vpop.permute.xlu0 %536 }
 0x189   : > { %vm5211_vm9 = vmand %vm5173_vm4, %vm1646_vm14  ;;  %v1903_v27 = vsub.f32 %v903_v54, %v313_v53  ;;  %v1904_v57 = vsub.f32 %v904_v39, %v314_v18  ;;  %v424_v29 = vadd.s32 168, %v2823_v1  ;;  %vm1134_vm15 = vcmp.eq.s32.totalorder %v1082_v26, 1  ;;  %v1085_v53 = vpop.permute.xlu1 %1084 }
 0x18a   : > { %vm5217_vm8 = vmand %vm5173_vm4, %vm1647_vm0  ;;  %v2029_v62 = vmul.f32 %v1901_v46, %v773_v51  ;;  %vm650_vm12 = vcmp.eq.s32.totalorder %v2837_v11, %v5144_v52  ;;  %v2282_v35 = vadd.f32 %v2281_v49, %v2154_v19  ;;  %v2030_v56 = vmul.f32 %v1902_v24, %v774_v14 }
 0x18b   : > { %vm5226_vm5 = vmand %vm5173_vm4, %vm1648_vm2  ;;  %v2031_v32 = vmul.f32 %v1903_v27, %v775_v50  ;;  %v5230_v37 = vmul.f32 %v1904_v57, %v776_v40  ;;  %v458_v47 = vadd.s32 %v2831_v7, %v424_v29  ;;  %vm6584_vm11 = vcmp.ne.s32.totalorder %v2826_v4, 0  ;;  %v319_v27 = vld [vmem:[%s2746_s6 + $0x2c0] sm:$0xff]  ;;  %v320_v57 = vld [vmem:[%s2746_s6 + $0x2c8] sm:$0xff] }
 0x18c   : > { %v2157_v16 = vsel %vm5205_vm6, %v2029_v62, 0.0  ;;  %vm5238_vm1 = vmand %vm1134_vm15, %vm6584_vm11  ;;  %vm651_vm3 = vcmp.eq.s32.totalorder %v2840_v12, %v5144_v52  ;;  %vm652_vm13 = vcmp.eq.s32.totalorder %v2858_v22, %v5144_v52  ;;  %v2283_v5 = vadd.f32 %v2282_v35, %v2155_v21  ;;  %v5331_v46 = vpop.permute.xlu0 %539  ;;  %v321_v62 = vld [vmem:[%s2746_s6 + $0x2d0] sm:$0xff]  ;;  %v322_v29 = vld [vmem:[%s2746_s6 + $0x2d8] sm:$0xff] }
 0x18d   : > { %v2158_v61 = vsel %vm5211_vm9, %v2030_v56, 0.0  ;;  %v2159_v55 = vsel %vm5217_vm8, %v2031_v32, 0.0  ;;  %v2160_v45 = vsel %vm5226_vm5, %v5230_v37, 0.0  ;;  %vm1294_vm4 = vcmp.lt.s32.totalorder %v458_v47, 300 }
 0x18e   : > { %v777_v59 = vsel %vm649_vm7, 0.9, %v2635_v8  ;;  %v778_v20 = vsel %vm650_vm12, 0.9, %v2635_v8  ;;  %v425_v17 = vadd.s32 176, %v2823_v1  ;;  %v2284_v0 = vadd.f32 %v2283_v5, %v2156_v38  ;;  %vm5268_vm10 = vmand %vm5238_vm1, %vm1294_vm4 }
 0x18f   : > { %v779_v15 = vsel %vm651_vm3, 0.9, %v2635_v8  ;;  %v780_v48 = vsel %vm652_vm13, 0.9, %v2635_v8  ;;  %v905_v2 = vsel %vm649_vm7, -0.105360515, %v6283_v6  ;;  %vm5285_vm14 = vmand %vm1134_vm15, %vm1294_vm4  ;;  %vm653_vm5 = vcmp.eq.s32.totalorder %v2826_v4, %v537_v36 }
 0x190   : > { %v906_v19 = vsel %vm650_vm12, -0.105360515, %v6283_v6  ;;  %v907_v21 = vsel %vm651_vm3, -0.105360515, %v6283_v6  ;;  %v908_v38 = vsel %vm652_vm13, -0.105360515, %v6283_v6  ;;  %v1905_v42 = vsub.f32 %v905_v2, %v315_v41 }
 0x191   : > { %v2285_v18 = vadd.f32 %v2284_v0, %v2157_v16  ;;  %vm1649_vm7 = vcmp.gt.f32.partialorder %v777_v59, 0.0  ;;  %vm1650_vm0 = vcmp.gt.f32.partialorder %v778_v20, 0.0  ;;  %vm1651_vm2 = vcmp.gt.f32.partialorder %v779_v15, 0.0 }
 0x192   : > { %vm1652_vm6 = vcmp.gt.f32.partialorder %v780_v48, 0.0  ;;  %vm5303_vm9 = vmand %vm5268_vm10, %vm1649_vm7  ;;  %v1906_v43 = vsub.f32 %v906_v19, %v316_v23  ;;  %v1907_v51 = vsub.f32 %v907_v21, %v317_v63  ;;  %v1908_v14 = vsub.f32 %v908_v38, %v318_v3  ;;  %v323_v38 = vld [vmem:[%s2746_s6 + $0x2e0] sm:$0xff] }
 0x193   : > { %v2286_v50 = vadd.f32 %v2285_v18, %v2158_v61  ;;  %vm5309_vm8 = vmand %vm5285_vm14, %vm1650_vm0  ;;  %v2033_v31 = vmul.f32 %v1905_v42, %v777_v59  ;;  %v459_v40 = vadd.s32 %v2831_v7, %v425_v17  ;;  %vm1135_vm15 = vcmp.eq.s32.totalorder %v1085_v53, 1 }
 0x194   : > { %vm5316_vm12 = vmand %vm5285_vm14, %vm1651_vm2  ;;  %v2034_v13 = vmul.f32 %v1906_v43, %v778_v20  ;;  %v2035_v44 = vmul.f32 %v1907_v51, %v779_v15  ;;  %v2036_v54 = vmul.f32 %v1908_v14, %v780_v48  ;;  %vm654_vm3 = vcmp.eq.s32.totalorder %v2837_v11, %v537_v36  ;;  %v324_v43 = vld [vmem:[%s2746_s6 + $0x2e8] sm:$0xff]  ;;  %v325_v51 = vld [vmem:[%s2746_s6 + $0x2f0] sm:$0xff] }
 0x195   : > { %v2287_v39 = vadd.f32 %v2286_v50, %v2159_v55  ;;  %vm5324_vm11 = vmand %vm5285_vm14, %vm1652_vm6  ;;  %v2161_v58 = vsel %vm5303_vm9, %v2033_v31, 0.0  ;;  %vm1295_vm1 = vcmp.lt.s32.totalorder %v459_v40, 300  ;;  %vm6599_vm13 = vcmp.ne.s32.totalorder %v2826_v4, 0  ;;  %v1088_v55 = vpop.permute.xlu1 %1087  ;;  %v326_v14 = vld [vmem:[%s2746_s6 + $0x2f8] sm:$0xff] }
 0x196   : > { %v2162_v49 = vsel %vm5309_vm8, %v2034_v13, 0.0  ;;  %v2163_v30 = vsel %vm5316_vm12, %v2035_v44, 0.0  ;;  %v2164_v24 = vsel %vm5324_vm11, %v2036_v54, 0.0  ;;  %vm1233_vm4 = vmand %vm1135_vm15, %vm6599_vm13  ;;  %vm655_vm10 = vcmp.eq.s32.totalorder %v2840_v12, %v537_v36 }
 0x197   : > { %v2288_v34 = vadd.f32 %v2287_v39, %v2160_v45  ;;  %vm656_vm14 = vcmp.eq.s32.totalorder %v2858_v22, %v537_v36  ;;  %v781_v35 = vsel %vm653_vm5, 0.9, %v2635_v8  ;;  %v782_v25 = vsel %vm654_vm3, 0.9, %v2635_v8  ;;  %vm5355_vm7 = vmand %vm1233_vm4, %vm1295_vm1  ;;  %v543_v39 = vpop.permute.xlu0 %542 }
 0x198   : > { %v783_v32 = vsel %vm655_vm10, 0.9, %v2635_v8  ;;  %v784_v37 = vsel %vm656_vm14, 0.9, %v2635_v8  ;;  %v909_v16 = vsel %vm653_vm5, -0.105360515, %v6283_v6  ;;  %vm657_vm0 = vcmp.eq.s32.totalorder %v2826_v4, %v5331_v46  ;;  %vm5368_vm2 = vmand %vm1135_vm15, %vm1295_vm1 }
 0x199   : > { %v2289_v47 = vadd.f32 %v2288_v34, %v2161_v58  ;;  %v910_v41 = vsel %vm654_vm3, -0.105360515, %v6283_v6  ;;  %v911_v5 = vsel %vm655_vm10, -0.105360515, %v6283_v6  ;;  %v912_v61 = vsel %vm656_vm14, -0.105360515, %v6283_v6 }
 0x19a   : > { %vm1653_vm6 = vcmp.gt.f32.partialorder %v781_v35, 0.0  ;;  %vm1654_vm9 = vcmp.gt.f32.partialorder %v782_v25, 0.0  ;;  %vm1655_vm8 = vcmp.gt.f32.partialorder %v783_v32, 0.0  ;;  %vm1656_vm12 = vcmp.gt.f32.partialorder %v784_v37, 0.0  ;;  %v331_v34 = vld [vmem:[%s2746_s6 + $0x320] sm:$0xff] }
 0x19b   : > { %v2290_v45 = vadd.f32 %v2289_v47, %v2162_v49  ;;  %vm5379_vm15 = vmand %vm5355_vm7, %vm1653_vm6  ;;  %v1909_v63 = vsub.f32 %v909_v16, %v319_v27  ;;  %v1910_v3 = vsub.f32 %v910_v41, %v320_v57  ;;  %v1911_v59 = vsub.f32 %v911_v5, %v321_v62  ;;  %v1091_v27 = vpop.permute.xlu1 %1090 }
 0x19c   : > { %vm5385_vm5 = vmand %vm5368_vm2, %vm1654_vm9  ;;  %v1912_v17 = vsub.f32 %v912_v61, %v322_v29  ;;  %v426_v0 = vadd.s32 184, %v2823_v1  ;;  %vm1136_vm11 = vcmp.eq.s32.totalorder %v1088_v55, 1  ;;  %vm658_vm1 = vcmp.eq.s32.totalorder %v2837_v11, %v5331_v46 }
 0x19d   : > { %v2291_v9 = vadd.f32 %v2290_v45, %v2163_v30  ;;  %vm5394_vm3 = vmand %vm5368_vm2, %vm1655_vm8  ;;  %v2037_v48 = vmul.f32 %v1909_v63, %v781_v35  ;;  %v2038_v2 = vmul.f32 %v1910_v3, %v782_v25  ;;  %v2039_v36 = vmul.f32 %v1911_v59, %v783_v32  ;;  %v5497_v45 = vpop.permute.xlu0 %545  ;;  %v327_v59 = vld [vmem:[%s2746_s6 + $0x300] sm:$0xff] }
 0x19e   : > { %vm5401_vm13 = vmand %vm5368_vm2, %vm1656_vm12  ;;  %v2040_v19 = vmul.f32 %v1912_v17, %v784_v37  ;;  %v460_v21 = vadd.s32 %v2831_v7, %v426_v0  ;;  %vm659_vm4 = vcmp.eq.s32.totalorder %v2840_v12, %v5331_v46  ;;  %vm660_vm10 = vcmp.eq.s32.totalorder %v2858_v22, %v5331_v46  ;;  %v328_v17 = vld [vmem:[%s2746_s6 + $0x308] sm:$0xff]  ;;  %v329_v0 = vld [vmem:[%s2746_s6 + $0x310] sm:$0xff] }
 0x19f   : > { %v2292_v42 = vadd.f32 %v2291_v9, %v2164_v24  ;;  %v2165_v53 = vsel %vm5379_vm15, %v2037_v48, 0.0  ;;  %v2166_v18 = vsel %vm5385_vm5, %v2038_v2, 0.0  ;;  %v2167_v28 = vsel %vm5394_vm3, %v2039_v36, 0.0  ;;  %v330_v9 = vld [vmem:[%s2746_s6 + $0x318] sm:$0xff]  ;;  %v332_v46 = vld [vmem:[%s2746_s6 + $0x328] sm:$0xff] }
 0x1a0   : > { %vm6612_vm14 = vcmp.ne.s32.totalorder %v2826_v4, 0  ;;  %v2168_v50 = vsel %vm5401_vm13, %v2040_v19, 0.0  ;;  %vm1296_vm2 = vcmp.lt.s32.totalorder %v460_v21, 300  ;;  %v785_v52 = vsel %vm657_vm0, 0.9, %v2635_v8 }
 0x1a1   : > { %vm1237_vm7 = vmand %vm1136_vm11, %vm6612_vm14  ;;  %v786_v31 = vsel %vm658_vm1, 0.9, %v2635_v8  ;;  %v2293_v40 = vadd.f32 %v2292_v42, %v2165_v53  ;;  %v787_v13 = vsel %vm659_vm4, 0.9, %v2635_v8  ;;  %v788_v44 = vsel %vm660_vm10, 0.9, %v2635_v8 }
 0x1a2   : > { %vm5433_vm6 = vmand %vm1237_vm7, %vm1296_vm2  ;;  %v913_v54 = vsel %vm657_vm0, -0.105360515, %v6283_v6  ;;  %v914_v58 = vsel %vm658_vm1, -0.105360515, %v6283_v6  ;;  %v915_v49 = vsel %vm659_vm4, -0.105360515, %v6283_v6  ;;  %vm661_vm13 = vcmp.eq.s32.totalorder %v2826_v4, %v543_v39 }
 0x1a3   : > { %vm5450_vm9 = vmand %vm1136_vm11, %vm1296_vm2  ;;  %v916_v30 = vsel %vm660_vm10, -0.105360515, %v6283_v6  ;;  %v1913_v24 = vsub.f32 %v913_v54, %v323_v38  ;;  %v2294_v57 = vadd.f32 %v2293_v40, %v2166_v18  ;;  %vm1657_vm0 = vcmp.gt.f32.partialorder %v785_v52, 0.0  ;;  %v1094_v18 = vpop.permute.xlu1 %1093 }
 0x1a4   : > { %vm1658_vm8 = vcmp.gt.f32.partialorder %v786_v31, 0.0  ;;  %vm1659_vm12 = vcmp.gt.f32.partialorder %v787_v13, 0.0  ;;  %vm1660_vm15 = vcmp.gt.f32.partialorder %v788_v44, 0.0  ;;  %vm5468_vm5 = vmand %vm5433_vm6, %vm1657_vm0  ;;  %v1914_v62 = vsub.f32 %v914_v58, %v324_v43 }
 0x1a5   : > { %v1915_v29 = vsub.f32 %v915_v49, %v325_v51  ;;  %v1916_v35 = vsub.f32 %v916_v30, %v326_v14  ;;  %v2295_v25 = vadd.f32 %v2294_v57, %v2167_v28  ;;  %vm5474_vm11 = vmand %vm5450_vm9, %vm1658_vm8  ;;  %v2041_v56 = vmul.f32 %v1913_v24, %v785_v52  ;;  %v5575_v24 = vpop.permute.xlu0 %548  ;;  %v335_v51 = vld [vmem:[%s2746_s6 + $0x340] sm:$0xff] }
 0x1a6   : > { %v427_v32 = vadd.s32 192, %v2823_v1  ;;  %vm1137_vm1 = vcmp.eq.s32.totalorder %v1091_v27, 1  ;;  %vm5481_vm3 = vmand %vm5450_vm9, %vm1659_vm12  ;;  %v2042_v16 = vmul.f32 %v1914_v62, %v786_v31  ;;  %vm662_vm10 = vcmp.eq.s32.totalorder %v2837_v11, %v543_v39 }
 0x1a7   : > { %v2043_v47 = vmul.f32 %v1915_v29, %v787_v13  ;;  %v2044_v33 = vmul.f32 %v1916_v35, %v788_v44  ;;  %v2296_v41 = vadd.f32 %v2295_v25, %v2168_v50  ;;  %vm5489_vm4 = vmand %vm5450_vm9, %vm1660_vm15  ;;  %v2169_v61 = vsel %vm5468_vm5, %v2041_v56, 0.0  ;;  %v333_v56 = vld [vmem:[%s2746_s6 + $0x330] sm:$0xff] }
 0x1a8   : > { %v461_v55 = vadd.s32 %v2831_v7, %v427_v32  ;;  %v2170_v23 = vsel %vm5474_vm11, %v2042_v16, 0.0  ;;  %vm1241_vm7 = vmand %vm1137_vm1, %vm6612_vm14  ;;  %vm663_vm2 = vcmp.eq.s32.totalorder %v2840_v12, %v543_v39  ;;  %vm664_vm9 = vcmp.eq.s32.totalorder %v2858_v22, %v543_v39  ;;  %v334_v32 = vld [vmem:[%s2746_s6 + $0x338] sm:$0xff] }
 0x1a9   : > { %v2171_v63 = vsel %vm5481_vm3, %v2043_v47, 0.0  ;;  %v2172_v3 = vsel %vm5489_vm4, %v2044_v33, 0.0  ;;  %v2297_v20 = vadd.f32 %v2296_v41, %v2169_v61  ;;  %v789_v15 = vsel %vm661_vm13, 0.9, %v2635_v8 }
 0x1aa   : > { %vm1297_vm6 = vcmp.lt.s32.totalorder %v461_v55, 300  ;;  %v790_v2 = vsel %vm662_vm10, 0.9, %v2635_v8  ;;  %v791_v36 = vsel %vm663_vm2, 0.9, %v2635_v8  ;;  %vm665_vm8 = vcmp.eq.s32.totalorder %v2826_v4, %v5497_v45 }
 0x1ab   : > { %vm5517_vm0 = vmand %vm1241_vm7, %vm1297_vm6  ;;  %v792_v10 = vsel %vm664_vm9, 0.9, %v2635_v8  ;;  %v2298_v19 = vadd.f32 %v2297_v20, %v2170_v23  ;;  %v917_v38 = vsel %vm661_vm13, -0.105360515, %v6283_v6  ;;  %v918_v42 = vsel %vm662_vm10, -0.105360515, %v6283_v6 }
 0x1ac   : > { %vm5531_vm12 = vmand %vm1137_vm1, %vm1297_vm6  ;;  %v919_v53 = vsel %vm663_vm2, -0.105360515, %v6283_v6  ;;  %v920_v28 = vsel %vm664_vm9, -0.105360515, %v6283_v6  ;;  %vm1661_vm15 = vcmp.gt.f32.partialorder %v789_v15, 0.0  ;;  %vm1662_vm5 = vcmp.gt.f32.partialorder %v790_v2, 0.0 }
 0x1ad   : > { %vm1663_vm11 = vcmp.gt.f32.partialorder %v791_v36, 0.0  ;;  %v2299_v43 = vadd.f32 %v2298_v19, %v2171_v63  ;;  %vm1664_vm1 = vcmp.gt.f32.partialorder %v792_v10, 0.0  ;;  %vm5547_vm3 = vmand %vm5517_vm0, %vm1661_vm15  ;;  %v1917_v14 = vsub.f32 %v917_v38, %v327_v59  ;;  %v1097_v63 = vpop.permute.xlu1 %1096  ;;  %v339_v20 = vld [vmem:[%s2746_s6 + $0x360] sm:$0xff] }
 0x1ae   : > { %v1918_v50 = vsub.f32 %v918_v42, %v328_v17  ;;  %vm5553_vm13 = vmand %vm5531_vm12, %vm1662_vm5  ;;  %v1919_v31 = vsub.f32 %v919_v53, %v329_v0  ;;  %v1920_v40 = vsub.f32 %v920_v28, %v330_v9  ;;  %v428_v60 = vadd.s32 200, %v2823_v1 }
 0x1af   : > { %vm1138_vm4 = vcmp.eq.s32.totalorder %v1094_v18, 1  ;;  %v2300_v13 = vadd.f32 %v2299_v43, %v2172_v3  ;;  %vm5560_vm10 = vmand %vm5531_vm12, %vm1663_vm11  ;;  %v2045_v54 = vmul.f32 %v1917_v14, %v789_v15  ;;  %vm666_vm14 = vcmp.eq.s32.totalorder %v2837_v11, %v5497_v45  ;;  %v5667_v18 = vpop.permute.xlu0 %551 }
 0x1b0   : > { %v2046_v39 = vmul.f32 %v1918_v50, %v790_v2  ;;  %vm5568_vm7 = vmand %vm5531_vm12, %vm1664_vm1  ;;  %v2047_v58 = vmul.f32 %v1919_v31, %v791_v36  ;;  %v2048_v49 = vmul.f32 %v1920_v40, %v792_v10  ;;  %v462_v30 = vadd.s32 %v2831_v7, %v428_v60  ;;  %v336_v40 = vld [vmem:[%s2746_s6 + $0x348] sm:$0xff]  ;;  %v337_v60 = vld [vmem:[%s2746_s6 + $0x350] sm:$0xff] }
 0x1b1   : > { %vm667_vm2 = vcmp.eq.s32.totalorder %v2840_v12, %v5497_v45  ;;  %v2173_v27 = vsel %vm5547_vm3, %v2045_v54, 0.0  ;;  %vm6637_vm6 = vcmp.ne.s32.totalorder %v2826_v4, 0  ;;  %vm668_vm0 = vcmp.eq.s32.totalorder %v2858_v22, %v5497_v45 }
 0x1b2   : > { %v2174_v57 = vsel %vm5553_vm13, %v2046_v39, 0.0  ;;  %vm1245_vm9 = vmand %vm1138_vm4, %vm6637_vm6  ;;  %v793_v62 = vsel %vm665_vm8, 0.9, %v2635_v8  ;;  %v2175_v29 = vsel %vm5560_vm10, %v2047_v58, 0.0  ;;  %v2176_v35 = vsel %vm5568_vm7, %v2048_v49, 0.0 }
 0x1b3   : > { %v2301_v25 = vadd.f32 %v2300_v13, %v2173_v27  ;;  %vm1298_vm12 = vcmp.lt.s32.totalorder %v462_v30, 300  ;;  %v794_v16 = vsel %vm666_vm14, 0.9, %v2635_v8  ;;  %v795_v47 = vsel %vm667_vm2, 0.9, %v2635_v8  ;;  %v338_v13 = vld [vmem:[%s2746_s6 + $0x358] sm:$0xff] }
 0x1b4   : > { %vm5598_vm15 = vmand %vm1245_vm9, %vm1298_vm12  ;;  %v796_v33 = vsel %vm668_vm0, 0.9, %v2635_v8  ;;  %vm669_vm5 = vcmp.eq.s32.totalorder %v2826_v4, %v5575_v24  ;;  %v921_v61 = vsel %vm665_vm8, -0.105360515, %v6283_v6  ;;  %v922_v55 = vsel %vm666_vm14, -0.105360515, %v6283_v6 }
 0x1b5   : > { %v2302_v41 = vadd.f32 %v2301_v25, %v2174_v57  ;;  %vm5617_vm11 = vmand %vm1138_vm4, %vm1298_vm12  ;;  %v923_v23 = vsel %vm667_vm2, -0.105360515, %v6283_v6  ;;  %v924_v3 = vsel %vm668_vm0, -0.105360515, %v6283_v6  ;;  %vm1665_vm1 = vcmp.gt.f32.partialorder %v793_v62, 0.0 }
 0x1b6   : > { %vm1666_vm3 = vcmp.gt.f32.partialorder %v794_v16, 0.0  ;;  %vm1667_vm13 = vcmp.gt.f32.partialorder %v795_v47, 0.0  ;;  %vm1668_vm8 = vcmp.gt.f32.partialorder %v796_v33, 0.0  ;;  %vm5639_vm4 = vmand %vm5598_vm15, %vm1665_vm1  ;;  %v1921_v17 = vsub.f32 %v921_v61, %v331_v34  ;;  %v1100_v34 = vpop.permute.xlu1 %1099 }
 0x1b7   : > { %v2303_v59 = vadd.f32 %v2302_v41, %v2175_v29  ;;  %v1922_v0 = vsub.f32 %v922_v55, %v332_v46  ;;  %vm5645_vm10 = vmand %vm5617_vm11, %vm1666_vm3  ;;  %v1923_v45 = vsub.f32 %v923_v23, %v333_v56  ;;  %v1924_v15 = vsub.f32 %v924_v3, %v334_v32 }
 0x1b8   : > { %v429_v48 = vadd.s32 208, %v2823_v1  ;;  %vm1139_vm14 = vcmp.eq.s32.totalorder %v1097_v63, 1  ;;  %vm5652_vm7 = vmand %vm5617_vm11, %vm1667_vm13  ;;  %v2049_v10 = vmul.f32 %v1921_v17, %v793_v62  ;;  %vm670_vm2 = vcmp.eq.s32.totalorder %v2837_v11, %v5575_v24  ;;  %v5759_v63 = vpop.permute.xlu0 %554 }
 0x1b9   : > { %v2304_v2 = vadd.f32 %v2303_v59, %v2176_v35  ;;  %v2050_v19 = vmul.f32 %v1922_v0, %v794_v16  ;;  %vm5660_vm6 = vmand %vm5617_vm11, %vm1668_vm8  ;;  %v2051_v38 = vmul.f32 %v1923_v45, %v795_v47  ;;  %v2052_v42 = vmul.f32 %v1924_v15, %v796_v33  ;;  %v340_v15 = vld [vmem:[%s2746_s6 + $0x368] sm:$0xff]  ;;  %v346_v47 = vld [vmem:[%s2746_s6 + $0x398] sm:$0xff] }
 0x1ba   : > { %v463_v53 = vadd.s32 %v2831_v7, %v429_v48  ;;  %vm671_vm9 = vcmp.eq.s32.totalorder %v2840_v12, %v5575_v24  ;;  %v2177_v28 = vsel %vm5639_vm4, %v2049_v10, 0.0  ;;  %vm6650_vm0 = vcmp.ne.s32.totalorder %v2826_v4, 0  ;;  %v341_v48 = vld [vmem:[%s2746_s6 + $0x370] sm:$0xff] }
 0x1bb   : > { %v2178_v43 = vsel %vm5645_vm10, %v2050_v19, 0.0  ;;  %vm1249_vm12 = vmand %vm1139_vm14, %vm6650_vm0  ;;  %vm672_vm15 = vcmp.eq.s32.totalorder %v2858_v22, %v5575_v24  ;;  %v797_v14 = vsel %vm669_vm5, 0.9, %v2635_v8  ;;  %v2179_v50 = vsel %vm5652_vm7, %v2051_v38, 0.0 }
 0x1bc   : > { %v2180_v52 = vsel %vm5660_vm6, %v2052_v42, 0.0  ;;  %v2305_v31 = vadd.f32 %v2304_v2, %v2177_v28  ;;  %vm1299_vm11 = vcmp.lt.s32.totalorder %v463_v53, 300  ;;  %v798_v54 = vsel %vm670_vm2, 0.9, %v2635_v8  ;;  %v342_v2 = vld [vmem:[%s2746_s6 + $0x378] sm:$0xff] }
 0x1bd   : > { %vm5690_vm1 = vmand %vm1249_vm12, %vm1299_vm11  ;;  %v799_v39 = vsel %vm671_vm9, 0.9, %v2635_v8  ;;  %v800_v26 = vsel %vm672_vm15, 0.9, %v2635_v8  ;;  %vm673_vm3 = vcmp.eq.s32.totalorder %v2826_v4, %v5667_v18  ;;  %v925_v30 = vsel %vm669_vm5, -0.105360515, %v6283_v6 }
 0x1be   : > { %v2306_v58 = vadd.f32 %v2305_v31, %v2178_v43  ;;  %vm5709_vm13 = vmand %vm1139_vm14, %vm1299_vm11  ;;  %v926_v27 = vsel %vm670_vm2, -0.105360515, %v6283_v6  ;;  %v927_v57 = vsel %vm671_vm9, -0.105360515, %v6283_v6  ;;  %v928_v62 = vsel %vm672_vm15, -0.105360515, %v6283_v6 }
 0x1bf   : > { %vm1669_vm8 = vcmp.gt.f32.partialorder %v797_v14, 0.0  ;;  %vm1670_vm4 = vcmp.gt.f32.partialorder %v798_v54, 0.0  ;;  %vm1671_vm10 = vcmp.gt.f32.partialorder %v799_v39, 0.0  ;;  %vm1672_vm5 = vcmp.gt.f32.partialorder %v800_v26, 0.0 }
 0x1c0   : > { %v2307_v29 = vadd.f32 %v2306_v58, %v2179_v50  ;;  %vm5731_vm14 = vmand %vm5690_vm1, %vm1669_vm8  ;;  %v1925_v25 = vsub.f32 %v925_v30, %v335_v51  ;;  %v1926_v46 = vsub.f32 %v926_v27, %v336_v40  ;;  %v1927_v24 = vsub.f32 %v927_v57, %v337_v60  ;;  %v1103_v51 = vpop.permute.xlu1 %1102 }
 0x1c1   : > { %vm5737_vm7 = vmand %vm5709_vm13, %vm1670_vm4  ;;  %v1928_v32 = vsub.f32 %v928_v62, %v338_v13  ;;  %v430_v37 = vadd.s32 216, %v2823_v1  ;;  %vm1140_vm2 = vcmp.eq.s32.totalorder %v1100_v34, 1  ;;  %vm674_vm9 = vcmp.eq.s32.totalorder %v2837_v11, %v5667_v18  ;;  %v5851_v34 = vpop.permute.xlu0 %557 }
 0x1c2   : > { %v2308_v16 = vadd.f32 %v2307_v29, %v2180_v52  ;;  %vm5744_vm6 = vmand %vm5709_vm13, %vm1671_vm10  ;;  %v2053_v33 = vmul.f32 %v1925_v25, %v797_v14  ;;  %v2054_v41 = vmul.f32 %v1926_v46, %v798_v54  ;;  %v2055_v61 = vmul.f32 %v1927_v24, %v799_v39  ;;  %v343_v25 = vld [vmem:[%s2746_s6 + $0x380] sm:$0xff]  ;;  %v348_v52 = vld [vmem:[%s2746_s6 + $0x3a8] sm:$0xff] }
 0x1c3   : > { %vm5752_vm0 = vmand %vm5709_vm13, %vm1672_vm5  ;;  %v2056_v55 = vmul.f32 %v1928_v32, %v800_v26  ;;  %v464_v23 = vadd.s32 %v2831_v7, %v430_v37  ;;  %vm675_vm12 = vcmp.eq.s32.totalorder %v2840_v12, %v5667_v18  ;;  %vm6663_vm15 = vcmp.ne.s32.totalorder %v2826_v4, 0  ;;  %v344_v37 = vld [vmem:[%s2746_s6 + $0x388] sm:$0xff] }
 0x1c4   : > { %v2181_v3 = vsel %vm5731_vm14, %v2053_v33, 0.0  ;;  %v2182_v59 = vsel %vm5737_vm7, %v2054_v41, 0.0  ;;  %vm1253_vm11 = vmand %vm1140_vm2, %vm6663_vm15  ;;  %vm676_vm1 = vcmp.eq.s32.totalorder %v2858_v22, %v5667_v18  ;;  %v801_v17 = vsel %vm673_vm3, 0.9, %v2635_v8 }
 0x1c5   : > { %v2183_v0 = vsel %vm5744_vm6, %v2055_v61, 0.0  ;;  %v2184_v9 = vsel %vm5752_vm0, %v2056_v55, 0.0  ;;  %v2309_v45 = vadd.f32 %v2308_v16, %v2181_v3  ;;  %vm1300_vm13 = vcmp.lt.s32.totalorder %v464_v23, 300  ;;  %v345_v16 = vld [vmem:[%s2746_s6 + $0x390] sm:$0xff] }
 0x1c6   : > { %vm5782_vm8 = vmand %vm1253_vm11, %vm1300_vm13  ;;  %v802_v10 = vsel %vm674_vm9, 0.9, %v2635_v8  ;;  %v803_v19 = vsel %vm675_vm12, 0.9, %v2635_v8  ;;  %v804_v21 = vsel %vm676_vm1, 0.9, %v2635_v8  ;;  %vm677_vm4 = vcmp.eq.s32.totalorder %v2826_v4, %v5759_v63 }
 0x1c7   : > { %v2310_v38 = vadd.f32 %v2309_v45, %v2182_v59  ;;  %vm5801_vm10 = vmand %vm1140_vm2, %vm1300_vm13  ;;  %v929_v53 = vsel %vm673_vm3, -0.105360515, %v6283_v6  ;;  %v930_v28 = vsel %vm674_vm9, -0.105360515, %v6283_v6  ;;  %v931_v43 = vsel %vm675_vm12, -0.105360515, %v6283_v6  ;;  %v1106_v59 = vpop.permute.xlu1 %1105 }
 0x1c8   : > { %v932_v14 = vsel %vm676_vm1, -0.105360515, %v6283_v6  ;;  %vm1673_vm5 = vcmp.gt.f32.partialorder %v801_v17, 0.0  ;;  %vm1674_vm14 = vcmp.gt.f32.partialorder %v802_v10, 0.0  ;;  %vm1675_vm7 = vcmp.gt.f32.partialorder %v803_v19, 0.0 }
 0x1c9   : > { %v2311_v50 = vadd.f32 %v2310_v38, %v2183_v0  ;;  %vm1676_vm3 = vcmp.gt.f32.partialorder %v804_v21, 0.0  ;;  %vm5823_vm2 = vmand %vm5782_vm8, %vm1673_vm5  ;;  %v1929_v31 = vsub.f32 %v929_v53, %v339_v20  ;;  %v1930_v40 = vsub.f32 %v930_v28, %v340_v15 }
 0x1ca   : > { %vm5829_vm6 = vmand %vm5801_vm10, %vm1674_vm14  ;;  %v1931_v18 = vsub.f32 %v931_v43, %v341_v48  ;;  %v1932_v13 = vsub.f32 %v932_v14, %v342_v2  ;;  %v431_v44 = vadd.s32 224, %v2823_v1  ;;  %vm1141_vm9 = vcmp.eq.s32.totalorder %v1103_v51, 1 }
 0x1cb   : > { %v2312_v54 = vadd.f32 %v2311_v50, %v2184_v9  ;;  %vm5836_vm0 = vmand %vm5801_vm10, %vm1675_vm7  ;;  %v2057_v26 = vmul.f32 %v1929_v31, %v801_v17  ;;  %v2058_v58 = vmul.f32 %v1930_v40, %v802_v10  ;;  %vm678_vm12 = vcmp.eq.s32.totalorder %v2837_v11, %v5759_v63  ;;  %v347_v50 = vld [vmem:[%s2746_s6 + $0x3a0] sm:$0xff]  ;;  %v1109_v35 = vpop.permute.xlu1 %1108 }
 0x1cc   : > { %vm5844_vm15 = vmand %vm5801_vm10, %vm1676_vm3  ;;  %v2059_v30 = vmul.f32 %v1931_v18, %v803_v19  ;;  %v2060_v27 = vmul.f32 %v1932_v13, %v804_v21  ;;  %v465_v57 = vadd.s32 %v2831_v7, %v431_v44  ;;  %vm679_vm11 = vcmp.eq.s32.totalorder %v2840_v12, %v5759_v63  ;;  %v349_v13 = vld [vmem:[%s2746_s6 + $0x3b0] sm:$0xff]  ;;  %v350_v44 = vld [vmem:[%s2746_s6 + $0x3b8] sm:$0xff] }
 0x1cd   : > { %v2185_v62 = vsel %vm5823_vm2, %v2057_v26, 0.0  ;;  %v2186_v29 = vsel %vm5829_vm6, %v2058_v58, 0.0  ;;  %vm6676_vm1 = vcmp.ne.s32.totalorder %v2826_v4, 0  ;;  %vm680_vm8 = vcmp.eq.s32.totalorder %v2858_v22, %v5759_v63 }
 0x1ce   : > { %vm5860_vm13 = vmand %vm1141_vm9, %vm6676_vm1  ;;  %v805_v46 = vsel %vm677_vm4, 0.9, %v2635_v8  ;;  %v2187_v56 = vsel %vm5836_vm0, %v2059_v30, 0.0  ;;  %v2188_v24 = vsel %vm5844_vm15, %v2060_v27, 0.0  ;;  %v2313_v32 = vadd.f32 %v2312_v54, %v2185_v62  ;;  %v561_v54 = vpop.permute.xlu0 %560  ;;  %v356_v62 = vld [vmem:[%s2746_s6 + $0x3e8] sm:$0xff] }
 0x1cf   : > { %vm1301_vm10 = vcmp.lt.s32.totalorder %v465_v57, 300  ;;  %v806_v33 = vsel %vm678_vm12, 0.9, %v2635_v8  ;;  %v807_v41 = vsel %vm679_vm11, 0.9, %v2635_v8  ;;  %vm681_vm5 = vcmp.eq.s32.totalorder %v2826_v4, %v5851_v34 }
 0x1d0   : > { %v808_v5 = vsel %vm680_vm8, 0.9, %v2635_v8  ;;  %v2314_v61 = vadd.f32 %v2313_v32, %v2186_v29  ;;  %vm1549_vm14 = vmand %vm5860_vm13, %vm1301_vm10  ;;  %v933_v55 = vsel %vm677_vm4, -0.105360515, %v6283_v6  ;;  %v934_v23 = vsel %vm678_vm12, -0.105360515, %v6283_v6 }
 0x1d1   : > { %v935_v3 = vsel %vm679_vm11, -0.105360515, %v6283_v6  ;;  %vm5907_vm7 = vmand %vm1141_vm9, %vm1301_vm10  ;;  %v936_v17 = vsel %vm680_vm8, -0.105360515, %v6283_v6  ;;  %vm1677_vm4 = vcmp.gt.f32.partialorder %v805_v46, 0.0  ;;  %vm1678_vm3 = vcmp.gt.f32.partialorder %v806_v33, 0.0 }
 0x1d2   : > { %vm1679_vm2 = vcmp.gt.f32.partialorder %v807_v41, 0.0  ;;  %v2315_v0 = vadd.f32 %v2314_v61, %v2187_v56  ;;  %vm1680_vm6 = vcmp.gt.f32.partialorder %v808_v5, 0.0  ;;  %v1933_v9 = vsub.f32 %v933_v55, %v343_v25  ;;  %vm5915_vm0 = vmand %vm1549_vm14, %vm1677_vm4 }
 0x1d3   : > { %v1934_v45 = vsub.f32 %v934_v23, %v344_v37  ;;  %v1935_v48 = vsub.f32 %v935_v3, %v345_v16  ;;  %v1936_v2 = vsub.f32 %v936_v17, %v346_v47  ;;  %v432_v36 = vadd.s32 232, %v2823_v1  ;;  %vm5922_vm12 = vmand %vm5907_vm7, %vm1678_vm3 }
 0x1d4   : > { %vm1142_vm9 = vcmp.eq.s32.totalorder %v1106_v59, 1  ;;  %v2316_v63 = vadd.f32 %v2315_v0, %v2188_v24  ;;  %v2061_v19 = vmul.f32 %v1933_v9, %v805_v46  ;;  %vm682_vm15 = vcmp.eq.s32.totalorder %v2837_v11, %v5851_v34  ;;  %vm5931_vm11 = vmand %vm5907_vm7, %vm1679_vm2  ;;  %v351_v59 = vld [vmem:[%s2746_s6 + $0x3c0] sm:$0xff]  ;;  %v352_v9 = vld [vmem:[%s2746_s6 + $0x3c8] sm:$0xff] }
 0x1d5   : > { %v2062_v21 = vmul.f32 %v1934_v45, %v806_v33  ;;  %v2063_v42 = vmul.f32 %v1935_v48, %v807_v41  ;;  %v2064_v53 = vmul.f32 %v1936_v2, %v808_v5  ;;  %v466_v28 = vadd.s32 %v2831_v7, %v432_v36  ;;  %vm5941_vm13 = vmand %vm5907_vm7, %vm1680_vm6  ;;  %v353_v45 = vld [vmem:[%s2746_s6 + $0x3d0] sm:$0xff]  ;;  %v6042_v48 = vpop.permute.xlu0 %563 }
 0x1d6   : > { %vm683_vm1 = vcmp.eq.s32.totalorder %v2840_v12, %v5851_v34  ;;  %v2189_v51 = vsel %vm5915_vm0, %v2061_v19, 0.0  ;;  %vm684_vm8 = vcmp.eq.s32.totalorder %v2858_v22, %v5851_v34  ;;  %v809_v31 = vsel %vm681_vm5, 0.9, %v2635_v8 }
 0x1d7   : > { %v2190_v14 = vsel %vm5922_vm12, %v2062_v21, 0.0  ;;  %v2191_v40 = vsel %vm5931_vm11, %v2063_v42, 0.0  ;;  %v2192_v60 = vsel %vm5941_vm13, %v2064_v53, 0.0  ;;  %v2317_v18 = vadd.f32 %v2316_v63, %v2189_v51  ;;  %v354_v63 = vld [vmem:[%s2746_s6 + $0x3d8] sm:$0xff]  ;;  %v1112_v51 = vpop.permute.xlu1 %1111 }
 0x1d8   : > { %vm1302_vm10 = vcmp.lt.s32.totalorder %v466_v28, 300  ;;  %vm6689_vm14 = vcmp.ne.s32.totalorder %v2826_v4, 0  ;;  %v810_v39 = vsel %vm682_vm15, 0.9, %v2635_v8  ;;  %v811_v26 = vsel %vm683_vm1, 0.9, %v2635_v8 }
 0x1d9   : > { %vm1261_vm7 = vmand %vm1142_vm9, %vm6689_vm14  ;;  %v812_v58 = vsel %vm684_vm8, 0.9, %v2635_v8  ;;  %v2318_v49 = vadd.f32 %v2317_v18, %v2190_v14  ;;  %v937_v30 = vsel %vm681_vm5, -0.105360515, %v6283_v6  ;;  %v938_v27 = vsel %vm682_vm15, -0.105360515, %v6283_v6 }
 0x1da   : > { %v939_v57 = vsel %vm683_vm1, -0.105360515, %v6283_v6  ;;  %vm5991_vm4 = vmand %vm1261_vm7, %vm1302_vm10  ;;  %v940_v29 = vsel %vm684_vm8, -0.105360515, %v6283_v6  ;;  %vm1681_vm5 = vcmp.gt.f32.partialorder %v809_v31, 0.0  ;;  %vm1682_vm3 = vcmp.gt.f32.partialorder %v810_v39, 0.0 }
 0x1db   : > { %vm685_vm2 = vcmp.eq.s32.totalorder %v2826_v4, %v561_v54  ;;  %v2319_v25 = vadd.f32 %v2318_v49, %v2191_v40  ;;  %vm6002_vm6 = vmand %vm1142_vm9, %vm1302_vm10  ;;  %vm1683_vm0 = vcmp.gt.f32.partialorder %v811_v26, 0.0  ;;  %v1937_v56 = vsub.f32 %v937_v30, %v347_v50  ;;  %v355_v30 = vld [vmem:[%s2746_s6 + $0x3e0] sm:$0xff] }
 0x1dc   : > { %v1938_v24 = vsub.f32 %v938_v27, %v348_v52  ;;  %vm1684_vm12 = vcmp.gt.f32.partialorder %v812_v58, 0.0  ;;  %v1939_v32 = vsub.f32 %v939_v57, %v349_v13  ;;  %v1940_v34 = vsub.f32 %v940_v29, %v350_v44  ;;  %vm1809_vm15 = vmand %vm5991_vm4, %vm1681_vm5  ;;  %v357_v29 = vld [vmem:[%s2746_s6 + $0x3f0] sm:$0xff] }
 0x1dd   : > { %v433_v37 = vadd.s32 240, %v2823_v1  ;;  %v2320_v16 = vadd.f32 %v2319_v25, %v2192_v60  ;;  %v2065_v47 = vmul.f32 %v1937_v56, %v809_v31  ;;  %vm1143_vm9 = vcmp.eq.s32.totalorder %v1109_v35, 1  ;;  %vm6012_vm11 = vmand %vm6002_vm6, %vm1682_vm3 }
 0x1de   : > { %v2066_v33 = vmul.f32 %v1938_v24, %v810_v39  ;;  %v2067_v5 = vmul.f32 %v1939_v32, %v811_v26  ;;  %v2068_v61 = vmul.f32 %v1940_v34, %v812_v58  ;;  %vm686_vm1 = vcmp.eq.s32.totalorder %v2837_v11, %v561_v54  ;;  %vm6021_vm13 = vmand %vm6002_vm6, %vm1683_vm0  ;;  %v358_v32 = vld [vmem:[%s2746_s6 + $0x3f8] sm:$0xff] }
 0x1df   : > { %v467_v55 = vadd.s32 %v2831_v7, %v433_v37  ;;  %v2193_v3 = vsel %vm1809_vm15, %v2065_v47, 0.0  ;;  %vm687_vm8 = vcmp.eq.s32.totalorder %v2840_v12, %v561_v54  ;;  %vm6030_vm10 = vmand %vm6002_vm6, %vm1684_vm12  ;;  %vm688_vm14 = vcmp.eq.s32.totalorder %v2858_v22, %v561_v54 }
 0x1e0   : > { %v2194_v17 = vsel %vm6012_vm11, %v2066_v33, 0.0  ;;  %v2321_v0 = vadd.f32 %v2320_v16, %v2193_v3  ;;  %v813_v15 = vsel %vm685_vm2, 0.9, %v2635_v8  ;;  %v2195_v2 = vsel %vm6021_vm13, %v2067_v5, 0.0 }
 0x1e1   : > { %v2196_v36 = vsel %vm6030_vm10, %v2068_v61, 0.0  ;;  %vm1303_vm7 = vcmp.lt.s32.totalorder %v467_v55, 300  ;;  %vm6700_vm4 = vcmp.ne.s32.totalorder %v2826_v4, 0  ;;  %v814_v10 = vsel %vm686_vm1, 0.9, %v2635_v8 }
 0x1e2   : > { %vm1265_vm5 = vmand %vm1143_vm9, %vm6700_vm4  ;;  %v2322_v19 = vadd.f32 %v2321_v0, %v2194_v17  ;;  %v941_v21 = vsel %vm685_vm2, -0.105360515, %v6283_v6  ;;  %v942_v38 = vsel %vm686_vm1, -0.105360515, %v6283_v6  ;;  %v943_v42 = vsel %vm687_vm8, -0.105360515, %v6283_v6 }
 0x1e3   : > { %v815_v53 = vsel %vm687_vm8, 0.9, %v2635_v8  ;;  %v816_v28 = vsel %vm688_vm14, 0.9, %v2635_v8  ;;  %v944_v43 = vsel %vm688_vm14, -0.105360515, %v6283_v6  ;;  %vm689_vm3 = vcmp.eq.s32.totalorder %v2826_v4, %v6042_v48  ;;  %vm6072_vm2 = vmand %vm1265_vm5, %vm1303_vm7 }
 0x1e4   : > { %v2323_v14 = vadd.f32 %v2322_v19, %v2195_v2  ;;  %vm1685_vm6 = vcmp.gt.f32.partialorder %v813_v15, 0.0  ;;  %v1941_v52 = vsub.f32 %v941_v21, %v351_v59  ;;  %v1942_v31 = vsub.f32 %v942_v38, %v352_v9  ;;  %vm6078_vm0 = vmand %vm1143_vm9, %vm1303_vm7 }
 0x1e5   : > { %vm1686_vm12 = vcmp.gt.f32.partialorder %v814_v10, 0.0  ;;  %v1943_v60 = vsub.f32 %v943_v42, %v353_v45  ;;  %v1944_v18 = vsub.f32 %v944_v43, %v354_v63  ;;  %v434_v13 = vadd.s32 248, %v2823_v1  ;;  %vm1813_vm9 = vmand %vm6072_vm2, %vm1685_vm6  ;;  %v2205_v43 = vld [vmem:[#allocation5] sm:$0x1] }
 0x1e6   : > { %v2324_v44 = vadd.f32 %v2323_v14, %v2196_v36  ;;  %v2069_v54 = vmul.f32 %v1941_v52, %v813_v15  ;;  %v2070_v39 = vmul.f32 %v1942_v31, %v814_v10  ;;  %vm1144_vm15 = vcmp.eq.s32.totalorder %v1112_v51, 1  ;;  %vm6090_vm8 = vmand %vm6078_vm0, %vm1686_vm12 }
 0x1e7   : > { %vm1687_vm11 = vcmp.gt.f32.partialorder %v815_v53, 0.0  ;;  %vm1688_vm1 = vcmp.gt.f32.partialorder %v816_v28, 0.0  ;;  %v468_v26 = vadd.s32 %v2831_v7, %v434_v13  ;;  %vm690_vm13 = vcmp.eq.s32.totalorder %v2837_v11, %v6042_v48  ;;  %vm6102_vm5 = vmand %vm1144_vm15, %vm6700_vm4 }
 0x1e8   : > { %v2071_v58 = vmul.f32 %v1943_v60, %v815_v53  ;;  %v2197_v49 = vsel %vm1813_vm9, %v2069_v54, 0.0  ;;  %vm691_vm10 = vcmp.eq.s32.totalorder %v2840_v12, %v6042_v48  ;;  %vm692_vm14 = vcmp.eq.s32.totalorder %v2858_v22, %v6042_v48  ;;  %vm6115_vm2 = vmand %vm6078_vm0, %vm1687_vm11 }
 0x1e9   : > { %v2072_v7 = vmul.f32 %v1944_v18, %v816_v28  ;;  %v2325_v27 = vadd.f32 %v2324_v44, %v2197_v49  ;;  %vm1304_vm7 = vcmp.lt.s32.totalorder %v468_v26, 300  ;;  %v817_v35 = vsel %vm689_vm3, 0.9, %v2635_v8  ;;  %vm6133_vm6 = vmand %vm6078_vm0, %vm1688_vm1 }
 0x1ea   : > { %v2198_v46 = vsel %vm6090_vm8, %v2070_v39, 0.0  ;;  %v818_v56 = vsel %vm690_vm13, 0.9, %v2635_v8  ;;  %v945_v24 = vsel %vm689_vm3, -0.105360515, %v6283_v6  ;;  %v2199_v33 = vsel %vm6115_vm2, %v2071_v58, 0.0  ;;  %vm1561_vm3 = vmand %vm6102_vm5, %vm1304_vm7 }
 0x1eb   : > { %v2326_v37 = vadd.f32 %v2325_v27, %v2198_v46  ;;  %v946_v16 = vsel %vm690_vm13, -0.105360515, %v6283_v6  ;;  %v947_v4 = vsel %vm691_vm10, -0.105360515, %v6283_v6  ;;  %v948_v47 = vsel %vm692_vm14, -0.105360515, %v6283_v6  ;;  %vm6162_vm12 = vmand %vm1144_vm15, %vm1304_vm7 }
 0x1ec   : > { %vm1689_vm0 = vcmp.gt.f32.partialorder %v817_v35, 0.0  ;;  %v1945_v11 = vsub.f32 %v945_v24, %v355_v30  ;;  %v1946_v41 = vsub.f32 %v946_v16, %v356_v62  ;;  %v2200_v5 = vsel %vm6133_vm6, %v2072_v7, 0.0 }
 0x1ed   : > { %v2327_v61 = vadd.f32 %v2326_v37, %v2199_v33  ;;  %v819_v55 = vsel %vm691_vm10, 0.9, %v2635_v8  ;;  %v1947_v6 = vsub.f32 %v947_v4, %v357_v29  ;;  %vm1690_vm11 = vcmp.gt.f32.partialorder %v818_v56, 0.0  ;;  %vm1817_vm1 = vmand %vm1561_vm3, %vm1689_vm0 }
 0x1ee   : > { %v2073_v3 = vmul.f32 %v1945_v11, %v817_v35  ;;  %v2074_v59 = vmul.f32 %v1946_v41, %v818_v56  ;;  %v1948_v20 = vsub.f32 %v948_v47, %v358_v32  ;;  %v820_v17 = vsel %vm692_vm14, 0.9, %v2635_v8  ;;  %vm1818_vm15 = vmand %vm6162_vm12, %vm1690_vm11 }
 0x1ef   : > { %v2328_v0 = vadd.f32 %v2327_v61, %v2200_v5  ;;  %vm1691_vm9 = vcmp.gt.f32.partialorder %v819_v55, 0.0  ;;  %v2075_v12 = vmul.f32 %v1947_v6, %v819_v55  ;;  %vm1692_vm13 = vcmp.gt.f32.partialorder %v820_v17, 0.0 }
 0x1f0   : > { %v2201_v9 = vsel %vm1817_vm1, %v2073_v3, 0.0  ;;  %v2076_v15 = vmul.f32 %v1948_v20, %v820_v17  ;;  %v2202_v2 = vsel %vm1818_vm15, %v2074_v59, 0.0  ;;  %vm1819_vm8 = vmand %vm6162_vm12, %vm1691_vm9  ;;  %vm2344_vm14 = vcmask 0  }
 0x1f1   : > { %v2329_v45 = vadd.f32 %v2328_v0, %v2201_v9  ;;  %v2203_v63 = vsel %vm1819_vm8, %v2075_v12, 0.0  ;;  %vm1820_vm10 = vmand %vm6162_vm12, %vm1692_vm13 }
 0x1f2   : > { %v2204_v8 = vsel %vm1820_vm10, %v2076_v15, 0.0 }
 0x1f3   : > { %v2330_v36 = vadd.f32 %v2329_v45, %v2202_v2 }
 0x1f5   : > { %v2331_v22 = vadd.f32 %v2330_v36, %v2203_v63 }
 0x1f7   : > { %v2332_v48 = vadd.f32 %v2331_v22, %v2204_v8 }
 0x1f9   : > { %2333 = vadd.xlane.f32.xlu0 %v2332_v48 }
 0x286   : > { %v2334_v10 = vpop.xlane.xlu0 %2333 }
 0x287   : > { %v2335_v19 = vrot.slane %v2334_v10, 4 }
 0x289   : > { %v2336_v21 = vadd.f32 %v2335_v19, %v2334_v10 }
 0x28b   : > { %v2337_v38 = vrot.slane %v2336_v21, 2 }
 0x28d   : > { %v2338_v42 = vadd.f32 %v2337_v38, %v2336_v21 }
 0x28f   : > { %v2339_v53 = vrot.slane %v2338_v42, 1 }
 0x291   : > { %v2340_v28 = vadd.f32 %v2339_v53, %v2338_v42 }
 0x293   : > { %2453 = vpush %v2340_v28 }
 0x2c4   : > { %s2454_s9 = spop %2453 }
 0x2c5   : > { %v2342_v51 = vstv %s2454_s9 }
 0x2c6   : > { %v2343_v14 = vadd.f32 %v2342_v51, %v2205_v43 }
 0x2c8   : > { %2345 = vst.msk [vmem:[#allocation5] sm:$0x1] %vm2344_vm14, %v2343_v14 }
 0x2c9   : > { %2560 = shalt.err (!%p2557_p0)
}
 0x2ca   : > { %s2561_s23 = scalar_lea.hbm %s6224_s2, 16 }
 0x2cb   : > { %p2562_p1 = scmp.ne.s32.totalorder %s6224_s2, %s2561_s23  ;;  %p2567_p3 = scmp.lt.u32.totalorder %s2561_s23, %s6224_s2 }
 0x2cd   : > { %p2563_p13 = pnand %p2562_p1, %p6178_p7 }
 0x2cf   : > { %p2564_p2 = pneg %p2563_p13 }
 0x2d1   : > { %p2569_p10 = pnand %p2567_p3, %p2564_p2 }
 0x2d3   : > { %2572 = shalt.err (!%p2569_p10)
}
 0x2d4   : > { %2457 = dma.vmem_to_hbm [thread:$0]  (%p6178_p7), %s2354_s8, 16, %s6224_s2, [#allocation4]  }
 0x2d5   : > { %2602 = dma.done.wait (%p6178_p7), [#allocation4], 16  }
 0x2d6   : > { %2604 = vsyncadd (%p6178_p7), [#allocation4], 4294967280 }
 0x2d7 PF: > { %s16_s14 = sadd.s32 1, %s2627_s14   ;;  %s6716_s9 = smov %s2611_s10 }
 0x2d8   : > { %p13_p4 = scmp.ge.s32.totalorder %s16_s14, 4   ;;  %s6717_s10 = smov %s2615_s11 }
 0x2d9   : > { %s6718_s11 = smov %s2698_s20  ;;  %s6719_s12 = smov %s2623_s13 }
 0x2da   : > { %s6720_s13 = smov %s6722_s16  ;;  %15 = sbr.rel (!%p13_p4) target bundleno = 5 (0x5), region = 72 }
 0x2e1   :  { %2366 = vsyncpa [#allocation3], 1 }
 0x2e2   :  { %2368 = vsyncpa [#allocation3 + $0x1], 1 }
 0x2e3   :  { %2369 = vsyncpa [#allocation4], 1 }
 0x2e4   :  { %2371 = vsyncpa [#allocation4 + $0x1], 1 }

</bundles_post_ra>
